<compile_context>
chip_gen: v7x
topology: tpu7x:2x2x1
jax: 0.10.0
libtpu: 0.0.40
codegen_flags: <defaults>
</compile_context>

<pallas_src>
import functools
import math

import jax
import jax.numpy as jnp
from jax.experimental import pallas as pl
from jax.experimental.pallas import tpu as pltpu

EPS = 1e-5  # nn.LayerNorm default


def _layernorm(v, g, b):
    mu = jnp.mean(v, axis=-1, keepdims=True)
    var = jnp.mean((v - mu) ** 2, axis=-1, keepdims=True)
    return (v - mu) * jax.lax.rsqrt(var + EPS) * g + b


def _erf(x):
    # Abramowitz & Stegun 7.1.26 (max abs err ~1.5e-7): keeps torch's exact-erf GELU semantics
    # while only using exp / VPU ops guaranteed to lower in Mosaic.
    p = 0.3275911
    a1, a2, a3, a4, a5 = 0.254829592, -0.284496736, 1.421413741, -1.453152027, 1.061405429
    ax = jnp.abs(x)
    t = 1.0 / (1.0 + p * ax)
    poly = ((((a5 * t + a4) * t + a3) * t + a2) * t + a1) * t
    e = 1.0 - poly * jnp.exp(-ax * ax)
    return jnp.where(x >= 0, e, -e)


def _gelu_exact(x):
    return 0.5 * x * (1.0 + _erf(x * 0.7071067811865476))


# ---------------------------------------------------------------------------
# fused kernel: grid over layers, (B*S, E) activation resident in VMEM scratch
# ---------------------------------------------------------------------------
def fused_stack_kernel(x_ref, wqkv_ref, wo_ref, w1_ref, w2_ref,
                       small_ref, bqkv_ref, b1_ref,
                       lnh_ref, wout_ref, bout_ref,
                       o_ref, act_ref, *, num_heads, head_size, batch, seq):
    l = pl.program_id(0)
    num_layers = pl.num_programs(0)

    @pl.when(l == 0)
    def _():
        act_ref[...] = x_ref[...]                      # load the sub-model hidden states once

    x = act_ref[...]                                   # (B*S, E) f32, resident across layers
    E = x.shape[-1]

    small = small_ref[...]                             # (6, E): ln1g, ln1b, ln2g, ln2b, bo, b2
    ln1g, ln1b = small[0:1, :], small[1:2, :]
    ln2g, ln2b = small[2:3, :], small[3:4, :]
    bo, b2 = small[4:5, :], small[5:6, :]

    # ---- pre-norm 1 + fused QKV projection (bf16 operands, f32 accumulation) ----------------
    n1 = _layernorm(x, ln1g, ln1b)
    qkv = jnp.dot(n1.astype(jnp.bfloat16), wqkv_ref[...],
                  preferred_element_type=jnp.float32) + bqkv_ref[...]        # (B*S, 3E) f32

    # causal mask == nn.Transformer.generate_square_subsequent_mask(S)
    row = jax.lax.broadcasted_iota(jnp.int32, (seq, seq), 0)
    col = jax.lax.broadcasted_iota(jnp.int32, (seq, seq), 1)
    causal = col <= row

    scale = 1.0 / math.sqrt(head_size)
    cdims = (((1,), (1,)), ((), ()))                   # contract last dims, no batch dims

    ctx_rows = []
    for b in range(batch):                             # static unroll (B, H small & static)
        r0 = b * seq
        q_b = qkv[r0:r0 + seq, 0:E]
        k_b = qkv[r0:r0 + seq, E:2 * E].astype(jnp.bfloat16)
        v_b = qkv[r0:r0 + seq, 2 * E:3 * E].astype(jnp.bfloat16)
        head_ctx = []
        for h in range(num_heads):
            lo = h * head_size
            q_h = q_b[:, lo:lo + head_size].astype(jnp.bfloat16)
            k_h = k_b[:, lo:lo + head_size]
            v_h = v_b[:, lo:lo + head_size]
            # q @ k^T without an explicit transpose (contract last dims of both)
            s = jax.lax.dot_general(q_h, k_h, cdims,
                                    preferred_element_type=jnp.float32) * scale
            s = jnp.where(causal, s, -1e30)            # f32; exp() of masked entries is exactly 0
            s = s - jnp.max(s, axis=-1, keepdims=True)
            p = jnp.exp(s)
            p = p * pl.reciprocal(jnp.sum(p, axis=-1, keepdims=True), approx=True)
            head_ctx.append(jnp.dot(p.astype(jnp.bfloat16), v_h,
                                    preferred_element_type=jnp.float32))     # (S, Dh)
        ctx_rows.append(jnp.concatenate(head_ctx, axis=-1))                  # (S, E)
    ctx = jnp.concatenate(ctx_rows, axis=0)                                  # (B*S, E)

    # single full-depth output projection over all heads / all batches
    attn_out = jnp.dot(ctx.astype(jnp.bfloat16), wo_ref[...],
                       preferred_element_type=jnp.float32) + bo
    h1 = attn_out + x                                  # residual 1 (dropout = identity)

    # ---- pre-norm 2 + GELU FFN ---------------------------------------------------------------
    n2 = _layernorm(h1, ln2g, ln2b)
    hid = jnp.dot(n2.astype(jnp.bfloat16), w1_ref[...],
                  preferred_element_type=jnp.float32) + b1_ref[...]
    hid = _gelu_exact(hid)
    ff = jnp.dot(hid.astype(jnp.bfloat16), w2_ref[...],
                 preferred_element_type=jnp.float32) + b2
    x_new = h1 + ff                                    # residual 2 (dropout = identity)
    act_ref[...] = x_new

    # ---- fused lm_norm + lm_out on the LAST token only, after the last layer ------------------
    @pl.when(l == num_layers - 1)
    def _():
        x_last = jnp.concatenate(
            [x_new[b * seq + seq - 1: b * seq + seq, :] for b in range(batch)], axis=0)  # (B, E)
        lnh = lnh_ref[...]                             # (2, E): gain, bias
        n = _layernorm(x_last, lnh[0:1, :], lnh[1:2, :])
        o_ref[...] = (jnp.dot(n.astype(jnp.bfloat16), wout_ref[...],
                              preferred_element_type=jnp.float32)
                      + bout_ref[...]).astype(o_ref.dtype)


def model_forward(x, stacked, head, *, num_heads):
    """x: (B, S, E) hidden states from the frozen pretrained sub-model."""
    B, S, E = x.shape
    L = stacked["wqkv"].shape[0]
    V = head["wout"].shape[1]
    x2d = x.reshape(B * S, E)

    kernel = functools.partial(fused_stack_kernel, num_heads=num_heads,
                               head_size=E // num_heads, batch=B, seq=S)

    def layer_spec(a):        # (L, r, c) -> per-layer (r, c) block, layer picked by grid index
        return pl.BlockSpec((None,) + a.shape[1:], lambda l: (l, 0, 0))

    def shared2d(a):          # fetched once, resident across the whole layer loop
        return pl.BlockSpec(a.shape, lambda l: (0, 0))

    in_specs = [shared2d(x2d),
                layer_spec(stacked["wqkv"]), layer_spec(stacked["wo"]),
                layer_spec(stacked["w1"]), layer_spec(stacked["w2"]),
                layer_spec(stacked["small"]), layer_spec(stacked["bqkv"]),
                layer_spec(stacked["b1"]),
                shared2d(head["lnh"]), shared2d(head["wout"]), shared2d(head["bout"])]

    return pl.pallas_call(
        kernel,
        out_shape=jax.ShapeDtypeStruct((B, V), jnp.float32),
        grid=(L,),
        in_specs=in_specs,
        out_specs=pl.BlockSpec((B, V), lambda l: (0, 0)),
        scratch_shapes=[pltpu.VMEM((B * S, E), jnp.float32)],
        compiler_params=pltpu.CompilerParams(
            dimension_semantics=("arbitrary",),        # layers are sequential
            vmem_limit_bytes=32 * 1024 * 1024),        # explicit budget (fits v7x's 64 MiB too)
    )(x2d, stacked["wqkv"], stacked["wo"], stacked["w1"], stacked["w2"],
      stacked["small"], stacked["bqkv"], stacked["b1"],
      head["lnh"], head["wout"], head["bout"])


# ---------------------------------------------------------------------------
# deterministic parameter construction, packing, and pure-JAX f32 reference
# ---------------------------------------------------------------------------
def make_params(key, num_layers, embed_size, vocab_size):
    E, F = embed_size, 4 * embed_size

    def xavier(k, fi, fo):
        std = math.sqrt(2.0 / (fi + fo))
        return (std * jax.random.normal(k, (fi, fo))).astype(jnp.float32)

    def bias(k, fi, n):
        bound = 1.0 / math.sqrt(fi)
        return jax.random.uniform(k, (1, n), minval=-bound, maxval=bound, dtype=jnp.float32)

    keys = jax.random.split(key, num_layers + 1)
    layers = []
    for l in range(num_layers):
        ks = jax.random.split(keys[l], 12)
        wq, wk, wv = xavier(ks[0], E, E), xavier(ks[1], E, E), xavier(ks[2], E, E)
        bq, bk, bv = bias(ks[3], E, E), bias(ks[4], E, E), bias(ks[5], E, E)
        layers.append({
            "ln1g": jnp.ones((1, E), jnp.float32), "ln1b": jnp.zeros((1, E), jnp.float32),
            "ln2g": jnp.ones((1, E), jnp.float32), "ln2b": jnp.zeros((1, E), jnp.float32),
            "wqkv": jnp.concatenate([wq, wk, wv], axis=1),       # (E, 3E)
            "bqkv": jnp.concatenate([bq, bk, bv], axis=1),       # (1, 3E)
            "wo": xavier(ks[6], E, E), "bo": bias(ks[7], E, E),
            "w1": xavier(ks[8], E, F), "b1": bias(ks[9], E, F),
            "w2": xavier(ks[10], F, E), "b2": bias(ks[11], F, E),
        })
    kh = jax.random.split(keys[-1], 2)
    head = {"lng": jnp.ones((1, E), jnp.float32), "lnb": jnp.zeros((1, E), jnp.float32),
            "wout": xavier(kh[0], E, vocab_size), "bout": bias(kh[1], E, vocab_size)}
    return layers, head


def stack_layer_params(layers):
    """Stack per-layer params with a leading layer dim; weights -> bf16 MXU operands."""
    def st(key, dtype):
        return jnp.stack([p[key] for p in layers]).astype(dtype)
    small = jnp.stack([jnp.concatenate(
        [p["ln1g"], p["ln1b"], p["ln2g"], p["ln2b"], p["bo"], p["b2"]], axis=0)
        for p in layers]).astype(jnp.float32)                     # (L, 6, E)
    return {"wqkv": st("wqkv", jnp.bfloat16), "wo": st("wo", jnp.bfloat16),
            "w1": st("w1", jnp.bfloat16), "w2": st("w2", jnp.bfloat16),
            "small": small,
            "bqkv": st("bqkv", jnp.float32), "b1": st("b1", jnp.float32)}


def pack_head_params(head):
    return {"lnh": jnp.concatenate([head["lng"], head["lnb"]], axis=0),      # (2, E) f32
            "wout": head["wout"].astype(jnp.bfloat16),
            "bout": head["bout"].astype(jnp.float32)}


def ref_forward(x, layer_params, head_params, num_heads):
    """Pure-JAX f32 mirror of the PyTorch forward (causal mask, exact-erf GELU, last-token logits)."""
    B, S, E = x.shape
    Dh = E // num_heads
    mask = jnp.where(jnp.arange(S)[None, :] <= jnp.arange(S)[:, None], 0.0, -jnp.inf)  # (S, S)

    def ln(v, g, b):
        mu = v.mean(-1, keepdims=True)
        var = ((v - mu) ** 2).mean(-1, keepdims=True)
        return (v - mu) / jnp.sqrt(var + EPS) * g + b

    for p in layer_params:
        n1 = ln(x, p["ln1g"], p["ln1b"])
        qkv = n1 @ p["wqkv"] + p["bqkv"]
        q, k, v = qkv[..., :E], qkv[..., E:2 * E], qkv[..., 2 * E:]
        q = q.reshape(B, S, num_heads, Dh).transpose(0, 2, 1, 3)
        k = k.reshape(B, S, num_heads, Dh).transpose(0, 2, 1, 3)
        v = v.reshape(B, S, num_heads, Dh).transpose(0, 2, 1, 3)
        s = q @ k.transpose(0, 1, 3, 2) / math.sqrt(Dh) + mask
        w = jax.nn.softmax(s, axis=-1)
        o = (w @ v).transpose(0, 2, 1, 3).reshape(B, S, E)
        o = o @ p["wo"] + p["bo"]
        h1 = o + x
        n2 = ln(h1, p["ln2g"], p["ln2b"])
        ff = jax.nn.gelu(n2 @ p["w1"] + p["b1"], approximate=False) @ p["w2"] + p["b2"]
        x = h1 + ff
    x_last = x[:, -1, :]
    n = ln(x_last, head_params["lng"], head_params["lnb"])
    return n @ head_params["wout"] + head_params["bout"]


if __name__ == "__main__":
    # lane-dense small shapes: batch=2, seq=8, embed=128 (4 heads, Dh=32), 2 SFT layers, vocab=128
    B, S, E, H, L, V = 2, 8, 128, 4, 2, 128
    key = jax.random.PRNGKey(0)
    kx, kp = jax.random.split(key)
    x = jax.random.normal(kx, (B, S, E), dtype=jnp.float32)     # stands in for subSimpleGPT(src)
    layers_f32, head_f32 = make_params(kp, L, E, V)
    stacked = stack_layer_params(layers_f32)
    head = pack_head_params(head_f32)

    fwd = jax.jit(functools.partial(model_forward, num_heads=H))
    logits = jax.block_until_ready(fwd(x, stacked, head))

    ref = ref_forward(x, layers_f32, head_f32, H)
    assert logits.shape == (B, V)
    err = float(jnp.max(jnp.abs(logits - ref)))
    # bf16 MXU operands + approx reciprocal vs. an f32 reference: loosened tolerance; semantic
    # bugs (mask / LN / residual / head) would produce O(1) errors and still fail this check.
    assert jnp.allclose(logits, ref, atol=5e-2, rtol=5e-2), f"max abs err {err}"
    print("KERNEL_OK")
</pallas_src>

<mosaic_0001>
module attributes {stable_mosaic.version = 11 : i64} {
  func.func @fused_stack_kernel(%arg0: i32, %arg1: memref<16x128xf32, #tpu.memory_space<vmem>>, %arg2: memref<1x128x384xbf16, #tpu.memory_space<vmem>>, %arg3: memref<1x128x128xbf16, #tpu.memory_space<vmem>>, %arg4: memref<1x128x512xbf16, #tpu.memory_space<vmem>>, %arg5: memref<1x512x128xbf16, #tpu.memory_space<vmem>>, %arg6: memref<1x6x128xf32, #tpu.memory_space<vmem>>, %arg7: memref<1x1x384xf32, #tpu.memory_space<vmem>>, %arg8: memref<1x1x512xf32, #tpu.memory_space<vmem>>, %arg9: memref<2x128xf32, #tpu.memory_space<vmem>>, %arg10: memref<128x128xbf16, #tpu.memory_space<vmem>>, %arg11: memref<1x128xf32, #tpu.memory_space<vmem>>, %arg12: memref<2x128xf32, #tpu.memory_space<vmem>>, %arg13: memref<16x128xf32, #tpu.memory_space<vmem>>) attributes {dimension_semantics = [#tpu.dimension_semantics<arbitrary>], iteration_bounds = array<i64: 2>, scalar_prefetch = 0 : i64, scratch_operands = 1 : i64, tpu.core_type = #tpu.core_type<tc>, window_params = [{pipeline_mode = #tpu.pipeline_mode<synchronous>, transform_indices = @transform_0, window_bounds = array<i64: 16, 128>}, {transform_indices = @transform_1, window_bounds = array<i64: 1, 128, 384>}, {transform_indices = @transform_2, window_bounds = array<i64: 1, 128, 128>}, {transform_indices = @transform_3, window_bounds = array<i64: 1, 128, 512>}, {transform_indices = @transform_4, window_bounds = array<i64: 1, 512, 128>}, {transform_indices = @transform_5, window_bounds = array<i64: 1, 6, 128>}, {transform_indices = @transform_6, window_bounds = array<i64: 1, 1, 384>}, {transform_indices = @transform_7, window_bounds = array<i64: 1, 1, 512>}, {pipeline_mode = #tpu.pipeline_mode<synchronous>, transform_indices = @transform_8, window_bounds = array<i64: 2, 128>}, {pipeline_mode = #tpu.pipeline_mode<synchronous>, transform_indices = @transform_9, window_bounds = array<i64: 128, 128>}, {pipeline_mode = #tpu.pipeline_mode<synchronous>, transform_indices = @transform_10, window_bounds = array<i64: 1, 128>}, {pipeline_mode = #tpu.pipeline_mode<synchronous>, transform_indices = @transform_11, window_bounds = array<i64: 2, 128>}]} {
    %c0_i32 = arith.constant 0 : i32
    %0 = arith.cmpi eq, %arg0, %c0_i32 : i32
    %1 = arith.extui %0 : i1 to i32
    %c0_i32_0 = arith.constant 0 : i32
    %2 = arith.cmpi ne, %1, %c0_i32_0 : i32
    scf.if %2 {
      %c0_102 = arith.constant 0 : index
      %c0_103 = arith.constant 0 : index
      %314 = vector.load %arg1[%c0_102, %c0_103] : memref<16x128xf32, #tpu.memory_space<vmem>>, vector<16x128xf32>
      %c0_104 = arith.constant 0 : index
      %c0_105 = arith.constant 0 : index
      %315 = vector.load %arg13[%c0_104, %c0_105] : memref<16x128xf32, #tpu.memory_space<vmem>>, vector<16x128xf32>
      tpu.vector_store %arg13[%c0_104, %c0_105], %314 {strides = array<i32>} : memref<16x128xf32, #tpu.memory_space<vmem>>, vector<16x128xf32>,
    } else {
    }
    %c0 = arith.constant 0 : index
    %c0_1 = arith.constant 0 : index
    %3 = vector.load %arg13[%c0, %c0_1] : memref<16x128xf32, #tpu.memory_space<vmem>>, vector<16x128xf32>
    %c0_2 = arith.constant 0 : index
    %c0_3 = arith.constant 0 : index
    %c0_4 = arith.constant 0 : index
    %4 = vector.load %arg6[%c0_2, %c0_3, %c0_4] : memref<1x6x128xf32, #tpu.memory_space<vmem>>, vector<1x6x128xf32>
    %5 = vector.shape_cast %4 : vector<1x6x128xf32> to vector<6x128xf32>
    %6 = vector.extract_strided_slice %5 {offsets = [0, 0], sizes = [1, 128], strides = [1, 1]} : vector<6x128xf32> to vector<1x128xf32>
    %7 = vector.extract_strided_slice %5 {offsets = [1, 0], sizes = [1, 128], strides = [1, 1]} : vector<6x128xf32> to vector<1x128xf32>
    %8 = vector.extract_strided_slice %5 {offsets = [2, 0], sizes = [1, 128], strides = [1, 1]} : vector<6x128xf32> to vector<1x128xf32>
    %9 = vector.extract_strided_slice %5 {offsets = [3, 0], sizes = [1, 128], strides = [1, 1]} : vector<6x128xf32> to vector<1x128xf32>
    %10 = vector.extract_strided_slice %5 {offsets = [4, 0], sizes = [1, 128], strides = [1, 1]} : vector<6x128xf32> to vector<1x128xf32>
    %11 = vector.extract_strided_slice %5 {offsets = [5, 0], sizes = [1, 128], strides = [1, 1]} : vector<6x128xf32> to vector<1x128xf32>
    %cst = arith.constant dense<0.000000e+00> : vector<16xf32>
    %12 = vector.multi_reduction <add>, %3, %cst [1] : vector<16x128xf32> to vector<16xf32>
    %13 = vector.shape_cast %12 : vector<16xf32> to vector<16x1xf32>
    %cst_5 = arith.constant 1.280000e+02 : f32
    %14 = vector.broadcast %cst_5 : f32 to vector<16x1xf32>
    %15 = arith.divf %13, %14 : vector<16x1xf32>
    %16 = vector.broadcast %15 : vector<16x1xf32> to vector<16x128xf32>
    %17 = arith.subf %3, %16 : vector<16x128xf32>
    %18 = arith.mulf %17, %17 : vector<16x128xf32>
    %cst_6 = arith.constant dense<0.000000e+00> : vector<16xf32>
    %19 = vector.multi_reduction <add>, %18, %cst_6 [1] : vector<16x128xf32> to vector<16xf32>
    %20 = vector.shape_cast %19 : vector<16xf32> to vector<16x1xf32>
    %cst_7 = arith.constant 1.280000e+02 : f32
    %21 = vector.broadcast %cst_7 : f32 to vector<16x1xf32>
    %22 = arith.divf %20, %21 : vector<16x1xf32>
    %23 = vector.broadcast %15 : vector<16x1xf32> to vector<16x128xf32>
    %24 = arith.subf %3, %23 : vector<16x128xf32>
    %cst_8 = arith.constant 9.99999974E-6 : f32
    %25 = vector.broadcast %cst_8 : f32 to vector<16x1xf32>
    %26 = arith.addf %22, %25 : vector<16x1xf32>
    %27 = math.rsqrt %26 : vector<16x1xf32>
    %28 = vector.broadcast %27 : vector<16x1xf32> to vector<16x128xf32>
    %29 = arith.mulf %24, %28 : vector<16x128xf32>
    %30 = vector.broadcast %6 : vector<1x128xf32> to vector<16x128xf32>
    %31 = arith.mulf %29, %30 : vector<16x128xf32>
    %32 = vector.broadcast %7 : vector<1x128xf32> to vector<16x128xf32>
    %33 = arith.addf %31, %32 : vector<16x128xf32>
    %34 = arith.truncf %33 : vector<16x128xf32> to vector<16x128xbf16>
    %c0_9 = arith.constant 0 : index
    %c0_10 = arith.constant 0 : index
    %c0_11 = arith.constant 0 : index
    %35 = vector.load %arg2[%c0_9, %c0_10, %c0_11] : memref<1x128x384xbf16, #tpu.memory_space<vmem>>, vector<1x128x384xbf16>
    %36 = vector.shape_cast %35 : vector<1x128x384xbf16> to vector<128x384xbf16>
    %cst_12 = arith.constant dense<0.000000e+00> : vector<16x384xf32>
    %37 = tpu.matmul %34, %36, %cst_12 {dimension_numbers = #tpu.dot_dimension_numbers<[1], [0], [0], [1], [0, 0, 1, 1], [], []>} : vector<16x128xbf16>, vector<128x384xbf16>, vector<16x384xf32> -> vector<16x384xf32>
    %c0_13 = arith.constant 0 : index
    %c0_14 = arith.constant 0 : index
    %c0_15 = arith.constant 0 : index
    %38 = vector.load %arg7[%c0_13, %c0_14, %c0_15] : memref<1x1x384xf32, #tpu.memory_space<vmem>>, vector<1x1x384xf32>
    %39 = vector.shape_cast %38 : vector<1x1x384xf32> to vector<1x384xf32>
    %40 = vector.broadcast %39 : vector<1x384xf32> to vector<16x384xf32>
    %41 = arith.addf %37, %40 : vector<16x384xf32>
    %42 = tpu.iota {dimensions = array<i32: 0>} : vector<8x8xi32>
    %43 = tpu.iota {dimensions = array<i32: 1>} : vector<8x8xi32>
    %44 = arith.cmpi sle, %43, %42 : vector<8x8xi32>
    %45 = vector.extract_strided_slice %41 {offsets = [0, 0], sizes = [8, 128], strides = [1, 1]} : vector<16x384xf32> to vector<8x128xf32>
    %46 = vector.extract_strided_slice %41 {offsets = [0, 128], sizes = [8, 128], strides = [1, 1]} : vector<16x384xf32> to vector<8x128xf32>
    %47 = arith.truncf %46 : vector<8x128xf32> to vector<8x128xbf16>
    %48 = vector.extract_strided_slice %41 {offsets = [0, 256], sizes = [8, 128], strides = [1, 1]} : vector<16x384xf32> to vector<8x128xf32>
    %49 = arith.truncf %48 : vector<8x128xf32> to vector<8x128xbf16>
    %50 = vector.extract_strided_slice %45 {offsets = [0, 0], sizes = [8, 32], strides = [1, 1]} : vector<8x128xf32> to vector<8x32xf32>
    %51 = arith.truncf %50 : vector<8x32xf32> to vector<8x32xbf16>
    %52 = vector.extract_strided_slice %47 {offsets = [0, 0], sizes = [8, 32], strides = [1, 1]} : vector<8x128xbf16> to vector<8x32xbf16>
    %53 = vector.extract_strided_slice %49 {offsets = [0, 0], sizes = [8, 32], strides = [1, 1]} : vector<8x128xbf16> to vector<8x32xbf16>
    %cst_16 = arith.constant dense<0.000000e+00> : vector<8x8xf32>
    %54 = tpu.matmul %51, %52, %cst_16 {dimension_numbers = #tpu.dot_dimension_numbers<[1], [1], [0], [0], [0, 0, 1, 0], [], []>} : vector<8x32xbf16>, vector<8x32xbf16>, vector<8x8xf32> -> vector<8x8xf32>
    %cst_17 = arith.constant 0.176776692 : f32
    %55 = vector.broadcast %cst_17 : f32 to vector<8x8xf32>
    %56 = arith.mulf %54, %55 : vector<8x8xf32>
    %cst_18 = arith.constant -1.000000e+30 : f32
    %57 = vector.broadcast %cst_18 : f32 to vector<8x8xf32>
    %58 = arith.select %44, %56, %57 : vector<8x8xi1>, vector<8x8xf32>
    %cst_19 = arith.constant dense<0xFF800000> : vector<8xf32>
    %59 = vector.multi_reduction <maximumf>, %58, %cst_19 [1] : vector<8x8xf32> to vector<8xf32>
    %60 = vector.shape_cast %59 : vector<8xf32> to vector<8x1xf32>
    %61 = vector.broadcast %60 : vector<8x1xf32> to vector<8x8xf32>
    %62 = arith.subf %58, %61 : vector<8x8xf32>
    %63 = math.exp %62 : vector<8x8xf32>
    %cst_20 = arith.constant dense<0.000000e+00> : vector<8xf32>
    %64 = vector.multi_reduction <add>, %63, %cst_20 [1] : vector<8x8xf32> to vector<8xf32>
    %65 = vector.shape_cast %64 : vector<8xf32> to vector<8x1xf32>
    %66 = tpu.reciprocal %65 {approx = true} : vector<8x1xf32> -> vector<8x1xf32>
    %67 = vector.broadcast %66 : vector<8x1xf32> to vector<8x8xf32>
    %68 = arith.mulf %63, %67 : vector<8x8xf32>
    %69 = arith.truncf %68 : vector<8x8xf32> to vector<8x8xbf16>
    %cst_21 = arith.constant dense<0.000000e+00> : vector<8x32xf32>
    %70 = tpu.matmul %69, %53, %cst_21 {dimension_numbers = #tpu.dot_dimension_numbers<[1], [0], [0], [1], [0, 0, 1, 1], [], []>} : vector<8x8xbf16>, vector<8x32xbf16>, vector<8x32xf32> -> vector<8x32xf32>
    %71 = vector.extract_strided_slice %45 {offsets = [0, 32], sizes = [8, 32], strides = [1, 1]} : vector<8x128xf32> to vector<8x32xf32>
    %72 = arith.truncf %71 : vector<8x32xf32> to vector<8x32xbf16>
    %73 = vector.extract_strided_slice %47 {offsets = [0, 32], sizes = [8, 32], strides = [1, 1]} : vector<8x128xbf16> to vector<8x32xbf16>
    %74 = vector.extract_strided_slice %49 {offsets = [0, 32], sizes = [8, 32], strides = [1, 1]} : vector<8x128xbf16> to vector<8x32xbf16>
    %cst_22 = arith.constant dense<0.000000e+00> : vector<8x8xf32>
    %75 = tpu.matmul %72, %73, %cst_22 {dimension_numbers = #tpu.dot_dimension_numbers<[1], [1], [0], [0], [0, 0, 1, 0], [], []>} : vector<8x32xbf16>, vector<8x32xbf16>, vector<8x8xf32> -> vector<8x8xf32>
    %cst_23 = arith.constant 0.176776692 : f32
    %76 = vector.broadcast %cst_23 : f32 to vector<8x8xf32>
    %77 = arith.mulf %75, %76 : vector<8x8xf32>
    %cst_24 = arith.constant -1.000000e+30 : f32
    %78 = vector.broadcast %cst_24 : f32 to vector<8x8xf32>
    %79 = arith.select %44, %77, %78 : vector<8x8xi1>, vector<8x8xf32>
    %cst_25 = arith.constant dense<0xFF800000> : vector<8xf32>
    %80 = vector.multi_reduction <maximumf>, %79, %cst_25 [1] : vector<8x8xf32> to vector<8xf32>
    %81 = vector.shape_cast %80 : vector<8xf32> to vector<8x1xf32>
    %82 = vector.broadcast %81 : vector<8x1xf32> to vector<8x8xf32>
    %83 = arith.subf %79, %82 : vector<8x8xf32>
    %84 = math.exp %83 : vector<8x8xf32>
    %cst_26 = arith.constant dense<0.000000e+00> : vector<8xf32>
    %85 = vector.multi_reduction <add>, %84, %cst_26 [1] : vector<8x8xf32> to vector<8xf32>
    %86 = vector.shape_cast %85 : vector<8xf32> to vector<8x1xf32>
    %87 = tpu.reciprocal %86 {approx = true} : vector<8x1xf32> -> vector<8x1xf32>
    %88 = vector.broadcast %87 : vector<8x1xf32> to vector<8x8xf32>
    %89 = arith.mulf %84, %88 : vector<8x8xf32>
    %90 = arith.truncf %89 : vector<8x8xf32> to vector<8x8xbf16>
    %cst_27 = arith.constant dense<0.000000e+00> : vector<8x32xf32>
    %91 = tpu.matmul %90, %74, %cst_27 {dimension_numbers = #tpu.dot_dimension_numbers<[1], [0], [0], [1], [0, 0, 1, 1], [], []>} : vector<8x8xbf16>, vector<8x32xbf16>, vector<8x32xf32> -> vector<8x32xf32>
    %92 = vector.extract_strided_slice %45 {offsets = [0, 64], sizes = [8, 32], strides = [1, 1]} : vector<8x128xf32> to vector<8x32xf32>
    %93 = arith.truncf %92 : vector<8x32xf32> to vector<8x32xbf16>
    %94 = vector.extract_strided_slice %47 {offsets = [0, 64], sizes = [8, 32], strides = [1, 1]} : vector<8x128xbf16> to vector<8x32xbf16>
    %95 = vector.extract_strided_slice %49 {offsets = [0, 64], sizes = [8, 32], strides = [1, 1]} : vector<8x128xbf16> to vector<8x32xbf16>
    %cst_28 = arith.constant dense<0.000000e+00> : vector<8x8xf32>
    %96 = tpu.matmul %93, %94, %cst_28 {dimension_numbers = #tpu.dot_dimension_numbers<[1], [1], [0], [0], [0, 0, 1, 0], [], []>} : vector<8x32xbf16>, vector<8x32xbf16>, vector<8x8xf32> -> vector<8x8xf32>
    %cst_29 = arith.constant 0.176776692 : f32
    %97 = vector.broadcast %cst_29 : f32 to vector<8x8xf32>
    %98 = arith.mulf %96, %97 : vector<8x8xf32>
    %cst_30 = arith.constant -1.000000e+30 : f32
    %99 = vector.broadcast %cst_30 : f32 to vector<8x8xf32>
    %100 = arith.select %44, %98, %99 : vector<8x8xi1>, vector<8x8xf32>
    %cst_31 = arith.constant dense<0xFF800000> : vector<8xf32>
    %101 = vector.multi_reduction <maximumf>, %100, %cst_31 [1] : vector<8x8xf32> to vector<8xf32>
    %102 = vector.shape_cast %101 : vector<8xf32> to vector<8x1xf32>
    %103 = vector.broadcast %102 : vector<8x1xf32> to vector<8x8xf32>
    %104 = arith.subf %100, %103 : vector<8x8xf32>
    %105 = math.exp %104 : vector<8x8xf32>
    %cst_32 = arith.constant dense<0.000000e+00> : vector<8xf32>
    %106 = vector.multi_reduction <add>, %105, %cst_32 [1] : vector<8x8xf32> to vector<8xf32>
    %107 = vector.shape_cast %106 : vector<8xf32> to vector<8x1xf32>
    %108 = tpu.reciprocal %107 {approx = true} : vector<8x1xf32> -> vector<8x1xf32>
    %109 = vector.broadcast %108 : vector<8x1xf32> to vector<8x8xf32>
    %110 = arith.mulf %105, %109 : vector<8x8xf32>
    %111 = arith.truncf %110 : vector<8x8xf32> to vector<8x8xbf16>
    %cst_33 = arith.constant dense<0.000000e+00> : vector<8x32xf32>
    %112 = tpu.matmul %111, %95, %cst_33 {dimension_numbers = #tpu.dot_dimension_numbers<[1], [0], [0], [1], [0, 0, 1, 1], [], []>} : vector<8x8xbf16>, vector<8x32xbf16>, vector<8x32xf32> -> vector<8x32xf32>
    %113 = vector.extract_strided_slice %45 {offsets = [0, 96], sizes = [8, 32], strides = [1, 1]} : vector<8x128xf32> to vector<8x32xf32>
    %114 = arith.truncf %113 : vector<8x32xf32> to vector<8x32xbf16>
    %115 = vector.extract_strided_slice %47 {offsets = [0, 96], sizes = [8, 32], strides = [1, 1]} : vector<8x128xbf16> to vector<8x32xbf16>
    %116 = vector.extract_strided_slice %49 {offsets = [0, 96], sizes = [8, 32], strides = [1, 1]} : vector<8x128xbf16> to vector<8x32xbf16>
    %cst_34 = arith.constant dense<0.000000e+00> : vector<8x8xf32>
    %117 = tpu.matmul %114, %115, %cst_34 {dimension_numbers = #tpu.dot_dimension_numbers<[1], [1], [0], [0], [0, 0, 1, 0], [], []>} : vector<8x32xbf16>, vector<8x32xbf16>, vector<8x8xf32> -> vector<8x8xf32>
    %cst_35 = arith.constant 0.176776692 : f32
    %118 = vector.broadcast %cst_35 : f32 to vector<8x8xf32>
    %119 = arith.mulf %117, %118 : vector<8x8xf32>
    %cst_36 = arith.constant -1.000000e+30 : f32
    %120 = vector.broadcast %cst_36 : f32 to vector<8x8xf32>
    %121 = arith.select %44, %119, %120 : vector<8x8xi1>, vector<8x8xf32>
    %cst_37 = arith.constant dense<0xFF800000> : vector<8xf32>
    %122 = vector.multi_reduction <maximumf>, %121, %cst_37 [1] : vector<8x8xf32> to vector<8xf32>
    %123 = vector.shape_cast %122 : vector<8xf32> to vector<8x1xf32>
    %124 = vector.broadcast %123 : vector<8x1xf32> to vector<8x8xf32>
    %125 = arith.subf %121, %124 : vector<8x8xf32>
    %126 = math.exp %125 : vector<8x8xf32>
    %cst_38 = arith.constant dense<0.000000e+00> : vector<8xf32>
    %127 = vector.multi_reduction <add>, %126, %cst_38 [1] : vector<8x8xf32> to vector<8xf32>
    %128 = vector.shape_cast %127 : vector<8xf32> to vector<8x1xf32>
    %129 = tpu.reciprocal %128 {approx = true} : vector<8x1xf32> -> vector<8x1xf32>
    %130 = vector.broadcast %129 : vector<8x1xf32> to vector<8x8xf32>
    %131 = arith.mulf %126, %130 : vector<8x8xf32>
    %132 = arith.truncf %131 : vector<8x8xf32> to vector<8x8xbf16>
    %cst_39 = arith.constant dense<0.000000e+00> : vector<8x32xf32>
    %133 = tpu.matmul %132, %116, %cst_39 {dimension_numbers = #tpu.dot_dimension_numbers<[1], [0], [0], [1], [0, 0, 1, 1], [], []>} : vector<8x8xbf16>, vector<8x32xbf16>, vector<8x32xf32> -> vector<8x32xf32>
    %134 = tpu.concatenate %70, %91, %112, %133 in 1 : vector<8x32xf32>, vector<8x32xf32>, vector<8x32xf32>, vector<8x32xf32> -> vector<8x128xf32>
    %135 = vector.extract_strided_slice %41 {offsets = [8, 0], sizes = [8, 128], strides = [1, 1]} : vector<16x384xf32> to vector<8x128xf32>
    %136 = vector.extract_strided_slice %41 {offsets = [8, 128], sizes = [8, 128], strides = [1, 1]} : vector<16x384xf32> to vector<8x128xf32>
    %137 = arith.truncf %136 : vector<8x128xf32> to vector<8x128xbf16>
    %138 = vector.extract_strided_slice %41 {offsets = [8, 256], sizes = [8, 128], strides = [1, 1]} : vector<16x384xf32> to vector<8x128xf32>
    %139 = arith.truncf %138 : vector<8x128xf32> to vector<8x128xbf16>
    %140 = vector.extract_strided_slice %135 {offsets = [0, 0], sizes = [8, 32], strides = [1, 1]} : vector<8x128xf32> to vector<8x32xf32>
    %141 = arith.truncf %140 : vector<8x32xf32> to vector<8x32xbf16>
    %142 = vector.extract_strided_slice %137 {offsets = [0, 0], sizes = [8, 32], strides = [1, 1]} : vector<8x128xbf16> to vector<8x32xbf16>
    %143 = vector.extract_strided_slice %139 {offsets = [0, 0], sizes = [8, 32], strides = [1, 1]} : vector<8x128xbf16> to vector<8x32xbf16>
    %cst_40 = arith.constant dense<0.000000e+00> : vector<8x8xf32>
    %144 = tpu.matmul %141, %142, %cst_40 {dimension_numbers = #tpu.dot_dimension_numbers<[1], [1], [0], [0], [0, 0, 1, 0], [], []>} : vector<8x32xbf16>, vector<8x32xbf16>, vector<8x8xf32> -> vector<8x8xf32>
    %cst_41 = arith.constant 0.176776692 : f32
    %145 = vector.broadcast %cst_41 : f32 to vector<8x8xf32>
    %146 = arith.mulf %144, %145 : vector<8x8xf32>
    %cst_42 = arith.constant -1.000000e+30 : f32
    %147 = vector.broadcast %cst_42 : f32 to vector<8x8xf32>
    %148 = arith.select %44, %146, %147 : vector<8x8xi1>, vector<8x8xf32>
    %cst_43 = arith.constant dense<0xFF800000> : vector<8xf32>
    %149 = vector.multi_reduction <maximumf>, %148, %cst_43 [1] : vector<8x8xf32> to vector<8xf32>
    %150 = vector.shape_cast %149 : vector<8xf32> to vector<8x1xf32>
    %151 = vector.broadcast %150 : vector<8x1xf32> to vector<8x8xf32>
    %152 = arith.subf %148, %151 : vector<8x8xf32>
    %153 = math.exp %152 : vector<8x8xf32>
    %cst_44 = arith.constant dense<0.000000e+00> : vector<8xf32>
    %154 = vector.multi_reduction <add>, %153, %cst_44 [1] : vector<8x8xf32> to vector<8xf32>
    %155 = vector.shape_cast %154 : vector<8xf32> to vector<8x1xf32>
    %156 = tpu.reciprocal %155 {approx = true} : vector<8x1xf32> -> vector<8x1xf32>
    %157 = vector.broadcast %156 : vector<8x1xf32> to vector<8x8xf32>
    %158 = arith.mulf %153, %157 : vector<8x8xf32>
    %159 = arith.truncf %158 : vector<8x8xf32> to vector<8x8xbf16>
    %cst_45 = arith.constant dense<0.000000e+00> : vector<8x32xf32>
    %160 = tpu.matmul %159, %143, %cst_45 {dimension_numbers = #tpu.dot_dimension_numbers<[1], [0], [0], [1], [0, 0, 1, 1], [], []>} : vector<8x8xbf16>, vector<8x32xbf16>, vector<8x32xf32> -> vector<8x32xf32>
    %161 = vector.extract_strided_slice %135 {offsets = [0, 32], sizes = [8, 32], strides = [1, 1]} : vector<8x128xf32> to vector<8x32xf32>
    %162 = arith.truncf %161 : vector<8x32xf32> to vector<8x32xbf16>
    %163 = vector.extract_strided_slice %137 {offsets = [0, 32], sizes = [8, 32], strides = [1, 1]} : vector<8x128xbf16> to vector<8x32xbf16>
    %164 = vector.extract_strided_slice %139 {offsets = [0, 32], sizes = [8, 32], strides = [1, 1]} : vector<8x128xbf16> to vector<8x32xbf16>
    %cst_46 = arith.constant dense<0.000000e+00> : vector<8x8xf32>
    %165 = tpu.matmul %162, %163, %cst_46 {dimension_numbers = #tpu.dot_dimension_numbers<[1], [1], [0], [0], [0, 0, 1, 0], [], []>} : vector<8x32xbf16>, vector<8x32xbf16>, vector<8x8xf32> -> vector<8x8xf32>
    %cst_47 = arith.constant 0.176776692 : f32
    %166 = vector.broadcast %cst_47 : f32 to vector<8x8xf32>
    %167 = arith.mulf %165, %166 : vector<8x8xf32>
    %cst_48 = arith.constant -1.000000e+30 : f32
    %168 = vector.broadcast %cst_48 : f32 to vector<8x8xf32>
    %169 = arith.select %44, %167, %168 : vector<8x8xi1>, vector<8x8xf32>
    %cst_49 = arith.constant dense<0xFF800000> : vector<8xf32>
    %170 = vector.multi_reduction <maximumf>, %169, %cst_49 [1] : vector<8x8xf32> to vector<8xf32>
    %171 = vector.shape_cast %170 : vector<8xf32> to vector<8x1xf32>
    %172 = vector.broadcast %171 : vector<8x1xf32> to vector<8x8xf32>
    %173 = arith.subf %169, %172 : vector<8x8xf32>
    %174 = math.exp %173 : vector<8x8xf32>
    %cst_50 = arith.constant dense<0.000000e+00> : vector<8xf32>
    %175 = vector.multi_reduction <add>, %174, %cst_50 [1] : vector<8x8xf32> to vector<8xf32>
    %176 = vector.shape_cast %175 : vector<8xf32> to vector<8x1xf32>
    %177 = tpu.reciprocal %176 {approx = true} : vector<8x1xf32> -> vector<8x1xf32>
    %178 = vector.broadcast %177 : vector<8x1xf32> to vector<8x8xf32>
    %179 = arith.mulf %174, %178 : vector<8x8xf32>
    %180 = arith.truncf %179 : vector<8x8xf32> to vector<8x8xbf16>
    %cst_51 = arith.constant dense<0.000000e+00> : vector<8x32xf32>
    %181 = tpu.matmul %180, %164, %cst_51 {dimension_numbers = #tpu.dot_dimension_numbers<[1], [0], [0], [1], [0, 0, 1, 1], [], []>} : vector<8x8xbf16>, vector<8x32xbf16>, vector<8x32xf32> -> vector<8x32xf32>
    %182 = vector.extract_strided_slice %135 {offsets = [0, 64], sizes = [8, 32], strides = [1, 1]} : vector<8x128xf32> to vector<8x32xf32>
    %183 = arith.truncf %182 : vector<8x32xf32> to vector<8x32xbf16>
    %184 = vector.extract_strided_slice %137 {offsets = [0, 64], sizes = [8, 32], strides = [1, 1]} : vector<8x128xbf16> to vector<8x32xbf16>
    %185 = vector.extract_strided_slice %139 {offsets = [0, 64], sizes = [8, 32], strides = [1, 1]} : vector<8x128xbf16> to vector<8x32xbf16>
    %cst_52 = arith.constant dense<0.000000e+00> : vector<8x8xf32>
    %186 = tpu.matmul %183, %184, %cst_52 {dimension_numbers = #tpu.dot_dimension_numbers<[1], [1], [0], [0], [0, 0, 1, 0], [], []>} : vector<8x32xbf16>, vector<8x32xbf16>, vector<8x8xf32> -> vector<8x8xf32>
    %cst_53 = arith.constant 0.176776692 : f32
    %187 = vector.broadcast %cst_53 : f32 to vector<8x8xf32>
    %188 = arith.mulf %186, %187 : vector<8x8xf32>
    %cst_54 = arith.constant -1.000000e+30 : f32
    %189 = vector.broadcast %cst_54 : f32 to vector<8x8xf32>
    %190 = arith.select %44, %188, %189 : vector<8x8xi1>, vector<8x8xf32>
    %cst_55 = arith.constant dense<0xFF800000> : vector<8xf32>
    %191 = vector.multi_reduction <maximumf>, %190, %cst_55 [1] : vector<8x8xf32> to vector<8xf32>
    %192 = vector.shape_cast %191 : vector<8xf32> to vector<8x1xf32>
    %193 = vector.broadcast %192 : vector<8x1xf32> to vector<8x8xf32>
    %194 = arith.subf %190, %193 : vector<8x8xf32>
    %195 = math.exp %194 : vector<8x8xf32>
    %cst_56 = arith.constant dense<0.000000e+00> : vector<8xf32>
    %196 = vector.multi_reduction <add>, %195, %cst_56 [1] : vector<8x8xf32> to vector<8xf32>
    %197 = vector.shape_cast %196 : vector<8xf32> to vector<8x1xf32>
    %198 = tpu.reciprocal %197 {approx = true} : vector<8x1xf32> -> vector<8x1xf32>
    %199 = vector.broadcast %198 : vector<8x1xf32> to vector<8x8xf32>
    %200 = arith.mulf %195, %199 : vector<8x8xf32>
    %201 = arith.truncf %200 : vector<8x8xf32> to vector<8x8xbf16>
    %cst_57 = arith.constant dense<0.000000e+00> : vector<8x32xf32>
    %202 = tpu.matmul %201, %185, %cst_57 {dimension_numbers = #tpu.dot_dimension_numbers<[1], [0], [0], [1], [0, 0, 1, 1], [], []>} : vector<8x8xbf16>, vector<8x32xbf16>, vector<8x32xf32> -> vector<8x32xf32>
    %203 = vector.extract_strided_slice %135 {offsets = [0, 96], sizes = [8, 32], strides = [1, 1]} : vector<8x128xf32> to vector<8x32xf32>
    %204 = arith.truncf %203 : vector<8x32xf32> to vector<8x32xbf16>
    %205 = vector.extract_strided_slice %137 {offsets = [0, 96], sizes = [8, 32], strides = [1, 1]} : vector<8x128xbf16> to vector<8x32xbf16>
    %206 = vector.extract_strided_slice %139 {offsets = [0, 96], sizes = [8, 32], strides = [1, 1]} : vector<8x128xbf16> to vector<8x32xbf16>
    %cst_58 = arith.constant dense<0.000000e+00> : vector<8x8xf32>
    %207 = tpu.matmul %204, %205, %cst_58 {dimension_numbers = #tpu.dot_dimension_numbers<[1], [1], [0], [0], [0, 0, 1, 0], [], []>} : vector<8x32xbf16>, vector<8x32xbf16>, vector<8x8xf32> -> vector<8x8xf32>
    %cst_59 = arith.constant 0.176776692 : f32
    %208 = vector.broadcast %cst_59 : f32 to vector<8x8xf32>
    %209 = arith.mulf %207, %208 : vector<8x8xf32>
    %cst_60 = arith.constant -1.000000e+30 : f32
    %210 = vector.broadcast %cst_60 : f32 to vector<8x8xf32>
    %211 = arith.select %44, %209, %210 : vector<8x8xi1>, vector<8x8xf32>
    %cst_61 = arith.constant dense<0xFF800000> : vector<8xf32>
    %212 = vector.multi_reduction <maximumf>, %211, %cst_61 [1] : vector<8x8xf32> to vector<8xf32>
    %213 = vector.shape_cast %212 : vector<8xf32> to vector<8x1xf32>
    %214 = vector.broadcast %213 : vector<8x1xf32> to vector<8x8xf32>
    %215 = arith.subf %211, %214 : vector<8x8xf32>
    %216 = math.exp %215 : vector<8x8xf32>
    %cst_62 = arith.constant dense<0.000000e+00> : vector<8xf32>
    %217 = vector.multi_reduction <add>, %216, %cst_62 [1] : vector<8x8xf32> to vector<8xf32>
    %218 = vector.shape_cast %217 : vector<8xf32> to vector<8x1xf32>
    %219 = tpu.reciprocal %218 {approx = true} : vector<8x1xf32> -> vector<8x1xf32>
    %220 = vector.broadcast %219 : vector<8x1xf32> to vector<8x8xf32>
    %221 = arith.mulf %216, %220 : vector<8x8xf32>
    %222 = arith.truncf %221 : vector<8x8xf32> to vector<8x8xbf16>
    %cst_63 = arith.constant dense<0.000000e+00> : vector<8x32xf32>
    %223 = tpu.matmul %222, %206, %cst_63 {dimension_numbers = #tpu.dot_dimension_numbers<[1], [0], [0], [1], [0, 0, 1, 1], [], []>} : vector<8x8xbf16>, vector<8x32xbf16>, vector<8x32xf32> -> vector<8x32xf32>
    %224 = tpu.concatenate %160, %181, %202, %223 in 1 : vector<8x32xf32>, vector<8x32xf32>, vector<8x32xf32>, vector<8x32xf32> -> vector<8x128xf32>
    %225 = tpu.concatenate %134, %224 in 0 : vector<8x128xf32>, vector<8x128xf32> -> vector<16x128xf32>
    %226 = arith.truncf %225 : vector<16x128xf32> to vector<16x128xbf16>
    %c0_64 = arith.constant 0 : index
    %c0_65 = arith.constant 0 : index
    %c0_66 = arith.constant 0 : index
    %227 = vector.load %arg3[%c0_64, %c0_65, %c0_66] : memref<1x128x128xbf16, #tpu.memory_space<vmem>>, vector<1x128x128xbf16>
    %228 = vector.shape_cast %227 : vector<1x128x128xbf16> to vector<128x128xbf16>
    %cst_67 = arith.constant dense<0.000000e+00> : vector<16x128xf32>
    %229 = tpu.matmul %226, %228, %cst_67 {dimension_numbers = #tpu.dot_dimension_numbers<[1], [0], [0], [1], [0, 0, 1, 1], [], []>} : vector<16x128xbf16>, vector<128x128xbf16>, vector<16x128xf32> -> vector<16x128xf32>
    %230 = vector.broadcast %10 : vector<1x128xf32> to vector<16x128xf32>
    %231 = arith.addf %229, %230 : vector<16x128xf32>
    %232 = arith.addf %231, %3 : vector<16x128xf32>
    %cst_68 = arith.constant dense<0.000000e+00> : vector<16xf32>
    %233 = vector.multi_reduction <add>, %232, %cst_68 [1] : vector<16x128xf32> to vector<16xf32>
    %234 = vector.shape_cast %233 : vector<16xf32> to vector<16x1xf32>
    %cst_69 = arith.constant 1.280000e+02 : f32
    %235 = vector.broadcast %cst_69 : f32 to vector<16x1xf32>
    %236 = arith.divf %234, %235 : vector<16x1xf32>
    %237 = vector.broadcast %236 : vector<16x1xf32> to vector<16x128xf32>
    %238 = arith.subf %232, %237 : vector<16x128xf32>
    %239 = arith.mulf %238, %238 : vector<16x128xf32>
    %cst_70 = arith.constant dense<0.000000e+00> : vector<16xf32>
    %240 = vector.multi_reduction <add>, %239, %cst_70 [1] : vector<16x128xf32> to vector<16xf32>
    %241 = vector.shape_cast %240 : vector<16xf32> to vector<16x1xf32>
    %cst_71 = arith.constant 1.280000e+02 : f32
    %242 = vector.broadcast %cst_71 : f32 to vector<16x1xf32>
    %243 = arith.divf %241, %242 : vector<16x1xf32>
    %244 = vector.broadcast %236 : vector<16x1xf32> to vector<16x128xf32>
    %245 = arith.subf %232, %244 : vector<16x128xf32>
    %cst_72 = arith.constant 9.99999974E-6 : f32
    %246 = vector.broadcast %cst_72 : f32 to vector<16x1xf32>
    %247 = arith.addf %243, %246 : vector<16x1xf32>
    %248 = math.rsqrt %247 : vector<16x1xf32>
    %249 = vector.broadcast %248 : vector<16x1xf32> to vector<16x128xf32>
    %250 = arith.mulf %245, %249 : vector<16x128xf32>
    %251 = vector.broadcast %8 : vector<1x128xf32> to vector<16x128xf32>
    %252 = arith.mulf %250, %251 : vector<16x128xf32>
    %253 = vector.broadcast %9 : vector<1x128xf32> to vector<16x128xf32>
    %254 = arith.addf %252, %253 : vector<16x128xf32>
    %255 = arith.truncf %254 : vector<16x128xf32> to vector<16x128xbf16>
    %c0_73 = arith.constant 0 : index
    %c0_74 = arith.constant 0 : index
    %c0_75 = arith.constant 0 : index
    %256 = vector.load %arg4[%c0_73, %c0_74, %c0_75] : memref<1x128x512xbf16, #tpu.memory_space<vmem>>, vector<1x128x512xbf16>
    %257 = vector.shape_cast %256 : vector<1x128x512xbf16> to vector<128x512xbf16>
    %cst_76 = arith.constant dense<0.000000e+00> : vector<16x512xf32>
    %258 = tpu.matmul %255, %257, %cst_76 {dimension_numbers = #tpu.dot_dimension_numbers<[1], [0], [0], [1], [0, 0, 1, 1], [], []>} : vector<16x128xbf16>, vector<128x512xbf16>, vector<16x512xf32> -> vector<16x512xf32>
    %c0_77 = arith.constant 0 : index
    %c0_78 = arith.constant 0 : index
    %c0_79 = arith.constant 0 : index
    %259 = vector.load %arg8[%c0_77, %c0_78, %c0_79] : memref<1x1x512xf32, #tpu.memory_space<vmem>>, vector<1x1x512xf32>
    %260 = vector.shape_cast %259 : vector<1x1x512xf32> to vector<1x512xf32>
    %261 = vector.broadcast %260 : vector<1x512xf32> to vector<16x512xf32>
    %262 = arith.addf %258, %261 : vector<16x512xf32>
    %cst_80 = arith.constant 5.000000e-01 : f32
    %263 = vector.broadcast %cst_80 : f32 to vector<16x512xf32>
    %264 = arith.mulf %263, %262 : vector<16x512xf32>
    %cst_81 = arith.constant 0.707106769 : f32
    %265 = vector.broadcast %cst_81 : f32 to vector<16x512xf32>
    %266 = arith.mulf %262, %265 : vector<16x512xf32>
    %267 = math.absf %266 : vector<16x512xf32>
    %cst_82 = arith.constant 0.327591091 : f32
    %268 = vector.broadcast %cst_82 : f32 to vector<16x512xf32>
    %269 = arith.mulf %268, %267 : vector<16x512xf32>
    %cst_83 = arith.constant 1.000000e+00 : f32
    %270 = vector.broadcast %cst_83 : f32 to vector<16x512xf32>
    %271 = arith.addf %270, %269 : vector<16x512xf32>
    %cst_84 = arith.constant 1.000000e+00 : f32
    %272 = vector.broadcast %cst_84 : f32 to vector<16x512xf32>
    %273 = arith.divf %272, %271 : vector<16x512xf32>
    %cst_85 = arith.constant 1.06140542 : f32
    %274 = vector.broadcast %cst_85 : f32 to vector<16x512xf32>
    %275 = arith.mulf %274, %273 : vector<16x512xf32>
    %cst_86 = arith.constant -1.45315206 : f32
    %276 = vector.broadcast %cst_86 : f32 to vector<16x512xf32>
    %277 = arith.addf %275, %276 : vector<16x512xf32>
    %278 = arith.mulf %277, %273 : vector<16x512xf32>
    %cst_87 = arith.constant 1.42141378 : f32
    %279 = vector.broadcast %cst_87 : f32 to vector<16x512xf32>
    %280 = arith.addf %278, %279 : vector<16x512xf32>
    %281 = arith.mulf %280, %273 : vector<16x512xf32>
    %cst_88 = arith.constant -0.284496725 : f32
    %282 = vector.broadcast %cst_88 : f32 to vector<16x512xf32>
    %283 = arith.addf %281, %282 : vector<16x512xf32>
    %284 = arith.mulf %283, %273 : vector<16x512xf32>
    %cst_89 = arith.constant 0.254829586 : f32
    %285 = vector.broadcast %cst_89 : f32 to vector<16x512xf32>
    %286 = arith.addf %284, %285 : vector<16x512xf32>
    %287 = arith.mulf %286, %273 : vector<16x512xf32>
    %cst_90 = arith.constant 0.000000e+00 : f32
    %288 = vector.broadcast %cst_90 : f32 to vector<16x512xf32>
    %289 = arith.subf %288, %267 : vector<16x512xf32>
    %290 = arith.mulf %289, %267 : vector<16x512xf32>
    %291 = math.exp %290 : vector<16x512xf32>
    %292 = arith.mulf %287, %291 : vector<16x512xf32>
    %cst_91 = arith.constant 1.000000e+00 : f32
    %293 = vector.broadcast %cst_91 : f32 to vector<16x512xf32>
    %294 = arith.subf %293, %292 : vector<16x512xf32>
    %cst_92 = arith.constant 0.000000e+00 : f32
    %295 = vector.broadcast %cst_92 : f32 to vector<16x512xf32>
    %296 = arith.cmpf oge, %266, %295 : vector<16x512xf32>
    %cst_93 = arith.constant 0.000000e+00 : f32
    %297 = vector.broadcast %cst_93 : f32 to vector<16x512xf32>
    %298 = arith.subf %297, %294 : vector<16x512xf32>
    %299 = arith.select %296, %294, %298 : vector<16x512xi1>, vector<16x512xf32>
    %cst_94 = arith.constant 1.000000e+00 : f32
    %300 = vector.broadcast %cst_94 : f32 to vector<16x512xf32>
    %301 = arith.addf %300, %299 : vector<16x512xf32>
    %302 = arith.mulf %264, %301 : vector<16x512xf32>
    %303 = arith.truncf %302 : vector<16x512xf32> to vector<16x512xbf16>
    %c0_95 = arith.constant 0 : index
    %c0_96 = arith.constant 0 : index
    %c0_97 = arith.constant 0 : index
    %304 = vector.load %arg5[%c0_95, %c0_96, %c0_97] : memref<1x512x128xbf16, #tpu.memory_space<vmem>>, vector<1x512x128xbf16>
    %305 = vector.shape_cast %304 : vector<1x512x128xbf16> to vector<512x128xbf16>
    %cst_98 = arith.constant dense<0.000000e+00> : vector<16x128xf32>
    %306 = tpu.matmul %303, %305, %cst_98 {dimension_numbers = #tpu.dot_dimension_numbers<[1], [0], [0], [1], [0, 0, 1, 1], [], []>} : vector<16x512xbf16>, vector<512x128xbf16>, vector<16x128xf32> -> vector<16x128xf32>
    %307 = vector.broadcast %11 : vector<1x128xf32> to vector<16x128xf32>
    %308 = arith.addf %306, %307 : vector<16x128xf32>
    %309 = arith.addf %232, %308 : vector<16x128xf32>
    %c0_99 = arith.constant 0 : index
    %c0_100 = arith.constant 0 : index
    %310 = vector.load %arg13[%c0_99, %c0_100] : memref<16x128xf32, #tpu.memory_space<vmem>>, vector<16x128xf32>
    tpu.vector_store %arg13[%c0_99, %c0_100], %309 {strides = array<i32>} : memref<16x128xf32, #tpu.memory_space<vmem>>, vector<16x128xf32>,
    %c1_i32 = arith.constant 1 : i32
    %311 = arith.cmpi eq, %arg0, %c1_i32 : i32
    %312 = arith.extui %311 : i1 to i32
    %c0_i32_101 = arith.constant 0 : i32
    %313 = arith.cmpi ne, %312, %c0_i32_101 : i32
    scf.if %313 {
      %314 = vector.extract_strided_slice %309 {offsets = [7, 0], sizes = [1, 128], strides = [1, 1]} : vector<16x128xf32> to vector<1x128xf32>
      %315 = vector.extract_strided_slice %309 {offsets = [15, 0], sizes = [1, 128], strides = [1, 1]} : vector<16x128xf32> to vector<1x128xf32>
      %316 = tpu.concatenate %314, %315 in 0 : vector<1x128xf32>, vector<1x128xf32> -> vector<2x128xf32>
      %c0_102 = arith.constant 0 : index
      %c0_103 = arith.constant 0 : index
      %317 = vector.load %arg9[%c0_102, %c0_103] : memref<2x128xf32, #tpu.memory_space<vmem>>, vector<2x128xf32>
      %318 = vector.extract_strided_slice %317 {offsets = [0, 0], sizes = [1, 128], strides = [1, 1]} : vector<2x128xf32> to vector<1x128xf32>
      %319 = vector.extract_strided_slice %317 {offsets = [1, 0], sizes = [1, 128], strides = [1, 1]} : vector<2x128xf32> to vector<1x128xf32>
      %cst_104 = arith.constant dense<0.000000e+00> : vector<2xf32>
      %320 = vector.multi_reduction <add>, %316, %cst_104 [1] : vector<2x128xf32> to vector<2xf32>
      %321 = vector.shape_cast %320 : vector<2xf32> to vector<2x1xf32>
      %cst_105 = arith.constant 1.280000e+02 : f32
      %322 = vector.broadcast %cst_105 : f32 to vector<2x1xf32>
      %323 = arith.divf %321, %322 : vector<2x1xf32>
      %324 = vector.broadcast %323 : vector<2x1xf32> to vector<2x128xf32>
      %325 = arith.subf %316, %324 : vector<2x128xf32>
      %326 = arith.mulf %325, %325 : vector<2x128xf32>
      %cst_106 = arith.constant dense<0.000000e+00> : vector<2xf32>
      %327 = vector.multi_reduction <add>, %326, %cst_106 [1] : vector<2x128xf32> to vector<2xf32>
      %328 = vector.shape_cast %327 : vector<2xf32> to vector<2x1xf32>
      %cst_107 = arith.constant 1.280000e+02 : f32
      %329 = vector.broadcast %cst_107 : f32 to vector<2x1xf32>
      %330 = arith.divf %328, %329 : vector<2x1xf32>
      %331 = vector.broadcast %323 : vector<2x1xf32> to vector<2x128xf32>
      %332 = arith.subf %316, %331 : vector<2x128xf32>
      %cst_108 = arith.constant 9.99999974E-6 : f32
      %333 = vector.broadcast %cst_108 : f32 to vector<2x1xf32>
      %334 = arith.addf %330, %333 : vector<2x1xf32>
      %335 = math.rsqrt %334 : vector<2x1xf32>
      %336 = vector.broadcast %335 : vector<2x1xf32> to vector<2x128xf32>
      %337 = arith.mulf %332, %336 : vector<2x128xf32>
      %338 = vector.broadcast %318 : vector<1x128xf32> to vector<2x128xf32>
      %339 = arith.mulf %337, %338 : vector<2x128xf32>
      %340 = vector.broadcast %319 : vector<1x128xf32> to vector<2x128xf32>
      %341 = arith.addf %339, %340 : vector<2x128xf32>
      %342 = arith.truncf %341 : vector<2x128xf32> to vector<2x128xbf16>
      %c0_109 = arith.constant 0 : index
      %c0_110 = arith.constant 0 : index
      %343 = vector.load %arg10[%c0_109, %c0_110] : memref<128x128xbf16, #tpu.memory_space<vmem>>, vector<128x128xbf16>
      %cst_111 = arith.constant dense<0.000000e+00> : vector<2x128xf32>
      %344 = tpu.matmul %342, %343, %cst_111 {dimension_numbers = #tpu.dot_dimension_numbers<[1], [0], [0], [1], [0, 0, 1, 1], [], []>} : vector<2x128xbf16>, vector<128x128xbf16>, vector<2x128xf32> -> vector<2x128xf32>
      %c0_112 = arith.constant 0 : index
      %c0_113 = arith.constant 0 : index
      %345 = vector.load %arg11[%c0_112, %c0_113] : memref<1x128xf32, #tpu.memory_space<vmem>>, vector<1x128xf32>
      %346 = vector.broadcast %345 : vector<1x128xf32> to vector<2x128xf32>
      %347 = arith.addf %344, %346 : vector<2x128xf32>
      %c0_114 = arith.constant 0 : index
      %c0_115 = arith.constant 0 : index
      %348 = vector.load %arg12[%c0_114, %c0_115] : memref<2x128xf32, #tpu.memory_space<vmem>>, vector<2x128xf32>
      tpu.vector_store %arg12[%c0_114, %c0_115], %347 {strides = array<i32>} : memref<2x128xf32, #tpu.memory_space<vmem>>, vector<2x128xf32>,
    } else {
    }
    return
  }
  func.func @transform_0(%arg0: i32) -> (i32, i32) {
    %c0_i32 = arith.constant 0 : i32
    %c0_i32_0 = arith.constant 0 : i32
    %c0_i32_1 = arith.constant 0 : i32
    return %c0_i32, %c0_i32_0 : i32, i32
  }
  func.func @transform_1(%arg0: i32) -> (i32, i32, i32) {
    %c0_i32 = arith.constant 0 : i32
    %c0_i32_0 = arith.constant 0 : i32
    %c0_i32_1 = arith.constant 0 : i32
    return %arg0, %c0_i32, %c0_i32_0 : i32, i32, i32
  }
  func.func @transform_2(%arg0: i32) -> (i32, i32, i32) {
    %c0_i32 = arith.constant 0 : i32
    %c0_i32_0 = arith.constant 0 : i32
    %c0_i32_1 = arith.constant 0 : i32
    return %arg0, %c0_i32, %c0_i32_0 : i32, i32, i32
  }
  func.func @transform_3(%arg0: i32) -> (i32, i32, i32) {
    %c0_i32 = arith.constant 0 : i32
    %c0_i32_0 = arith.constant 0 : i32
    %c0_i32_1 = arith.constant 0 : i32
    return %arg0, %c0_i32, %c0_i32_0 : i32, i32, i32
  }
  func.func @transform_4(%arg0: i32) -> (i32, i32, i32) {
    %c0_i32 = arith.constant 0 : i32
    %c0_i32_0 = arith.constant 0 : i32
    %c0_i32_1 = arith.constant 0 : i32
    return %arg0, %c0_i32, %c0_i32_0 : i32, i32, i32
  }
  func.func @transform_5(%arg0: i32) -> (i32, i32, i32) {
    %c0_i32 = arith.constant 0 : i32
    %c0_i32_0 = arith.constant 0 : i32
    %c0_i32_1 = arith.constant 0 : i32
    return %arg0, %c0_i32, %c0_i32_0 : i32, i32, i32
  }
  func.func @transform_6(%arg0: i32) -> (i32, i32, i32) {
    %c0_i32 = arith.constant 0 : i32
    %c0_i32_0 = arith.constant 0 : i32
    %c0_i32_1 = arith.constant 0 : i32
    return %arg0, %c0_i32, %c0_i32_0 : i32, i32, i32
  }
  func.func @transform_7(%arg0: i32) -> (i32, i32, i32) {
    %c0_i32 = arith.constant 0 : i32
    %c0_i32_0 = arith.constant 0 : i32
    %c0_i32_1 = arith.constant 0 : i32
    return %arg0, %c0_i32, %c0_i32_0 : i32, i32, i32
  }
  func.func @transform_8(%arg0: i32) -> (i32, i32) {
    %c0_i32 = arith.constant 0 : i32
    %c0_i32_0 = arith.constant 0 : i32
    %c0_i32_1 = arith.constant 0 : i32
    return %c0_i32, %c0_i32_0 : i32, i32
  }
  func.func @transform_9(%arg0: i32) -> (i32, i32) {
    %c0_i32 = arith.constant 0 : i32
    %c0_i32_0 = arith.constant 0 : i32
    %c0_i32_1 = arith.constant 0 : i32
    return %c0_i32, %c0_i32_0 : i32, i32
  }
  func.func @transform_10(%arg0: i32) -> (i32, i32) {
    %c0_i32 = arith.constant 0 : i32
    %c0_i32_0 = arith.constant 0 : i32
    %c0_i32_1 = arith.constant 0 : i32
    return %c0_i32, %c0_i32_0 : i32, i32
  }
  func.func @transform_11(%arg0: i32) -> (i32, i32) {
    %c0_i32 = arith.constant 0 : i32
    %c0_i32_0 = arith.constant 0 : i32
    %c0_i32_1 = arith.constant 0 : i32
    return %c0_i32, %c0_i32_0 : i32, i32
  }
}

</mosaic_0001>

<bundles_post_ra>
// kernel: model_forward.1
= control target key start
LH: loop header
LB: loop body
LE: loop exit
PB: predicated region body
PF: predicated region fallthrough
CT: control target
= control target key end

     0   :  { %s5222_s0 = inlined_call_operand.hbm [shape: f32[16,128], index: 0, kind: input, shape index: {}]   ;;  %s5223_s1 = inlined_call_operand.hbm [shape: bf16[2,128,384], index: 1, kind: input, shape index: {}]   ;;  %s5224_s2 = inlined_call_operand.hbm [shape: bf16[2,128,128], index: 2, kind: input, shape index: {}]   ;;  %s5225_s3 = inlined_call_operand.hbm [shape: bf16[2,128,512], index: 3, kind: input, shape index: {}]   ;;  %s5226_s4 = inlined_call_operand.hbm [shape: bf16[2,512,128], index: 4, kind: input, shape index: {}]   ;;  %s5227_s5 = inlined_call_operand.vmem [shape: f32[2,6,128], index: 5, kind: input, shape index: {}]   ;;  %s5228_s6 = inlined_call_operand.hbm [shape: f32[2,1,384], index: 6, kind: input, shape index: {}]   ;;  %s5229_s7 = inlined_call_operand.hbm [shape: f32[2,1,512], index: 7, kind: input, shape index: {}]   ;;  %s5230_s8 = inlined_call_operand.vmem [shape: f32[2,128], index: 8, kind: input, shape index: {}]   ;;  %s5231_s9 = inlined_call_operand.vmem [shape: bf16[128,128], index: 9, kind: input, shape index: {}]   ;;  %s5232_s10 = inlined_call_operand.vmem [shape: f32[1,128], index: 10, kind: input, shape index: {}]   ;;  %s5233_s11 = inlined_call_operand.hbm [shape: f32[2,128], index: 11, kind: output, shape index: {}]  }
   0x1   :  { %5248 = sst [smem:[#allocation24_spill]] %s5223_s1 }
   0x2   :  { %5249 = sst [smem:[#allocation25_spill]] %s5225_s3 }
   0x3   :  { %5250 = sst [smem:[#allocation26_spill]] %s5228_s6 }
   0x4   :  { %5251 = sst [smem:[#allocation27_spill]] %s5230_s8 }
   0x5   :  { %5252 = sst [smem:[#allocation28_spill]] %s5232_s10 }
   0x6   :  { %5253 = sst [smem:[#allocation29_spill]] %s5233_s11 }
   0x7   :  { %16 = vsyncpa [#allocation4], 0 }
   0x8   :  { %17 = vsyncpa [#allocation7], 0 }
   0x9   :  { %19 = vsyncpa [#allocation7 + $0x1], 0 }
   0xa   :  { %20 = vsyncpa [#allocation10], 0 }
   0xb   :  { %22 = vsyncpa [#allocation10 + $0x1], 0 }
   0xc   :  { %23 = vsyncpa [#allocation13], 0 }
   0xd   :  { %25 = vsyncpa [#allocation13 + $0x1], 0 }
   0xe   :  { %26 = vsyncpa [#allocation5], 0  ;;  %s4316_s17 = smov 0   ;;  %s4318_s18 = smov 0  }
   0xf   :  { %s4320_s19 = smov 0   ;;  %s4322_s20 = smov 0  }
  0x10 LB: > { %5254 = sst [smem:[#allocation21_spill]] %s4226_s19  ;;  %s4337_s21 = sadd.s32 1, %s4230_s20   ;;  %s4230_s20 = sphi %s4322_s20, %s5283_s20   ;;  %s4226_s19 = sphi %s4320_s19, %s5285_s19   ;;  %s4222_s18 = sphi %s4318_s18, %s5287_s18   ;;  %s4218_s17 = sphi %s4316_s17, %s5286_s17  }
  0x11   : > { %5255 = sst [smem:[#allocation22_spill]] %s4337_s21  ;;  %s60_s22 = sadd.s32 1, %s4226_s19 }
  0x12   : > { %s57_s23 = ssub.s32 %s4230_s20, %s4337_s21  ;;  %p67_p0 = scmp.ne.s32.totalorder %s4226_s19, %s4222_s18 }
  0x13   : > { %p58_p1 = scmp.eq.s32.totalorder %s57_s23, 0  ;;  %p68_p2 = scmp.eq.s32.totalorder %s4230_s20, 0 }
  0x14   : > { %p3672_p3 = scmp.lt.s32.totalorder %s4230_s20, 2  ;;  %s4350_s25 = sand.u32 1, %s4230_s20  }
  0x15   : > { %s4347_s24 = scalar_select %p58_p1, %s4226_s19, %s60_s22  }
  0x16   : > { %p69_p4 = por %p68_p2, %p67_p0  ;;  %s4353_s26 = sand.u32 1, %s4226_s19  }
  0x17   : > { %5256 = sst [smem:[#allocation23_spill]] %s4347_s24  ;;  %s3622_s27 = smul.u32 192, %s4353_s26 }
  0x18   : > { %p4356_p5 = pnand %p3672_p3, %p69_p4  ;;  %s3623_s29 = smul.u32 3072, %s4230_s20 }
  0x19   : > { %s5258_s1 = sld [smem:[#allocation24_spill]]  ;;  %s363_s14 = scalar_lea.vmem [#allocation6], %s3622_s27 }
  0x1a   : > { %s5257_s28 = scalar_select %p4356_p5, 1, 0 }
  0x1b   : > { %s370_s15 = sshll.u32 %s363_s14, 4  ;;  %p4373_p7 = pneg %p4356_p5  ;;  %s4366_s15 = int_to_ptr.vmem [resolvable:$true] %s370_s15 }
  0x1d   : > { %s5259_s23 = scalar_select %p4373_p7, 1, 0 }
  0x1f   : > { %s4364_s13 = scalar_lea.hbm %s5258_s1, %s3623_s29  ;;  %s3951_s12 = scalar_lea.hbm %s5258_s1, 6144 }
  0x20   : > { %s3946_s22 = scalar_lea.hbm %s4364_s13, 3072  ;;  %p3952_p10 = scmp.lt.u32.totalorder %s4364_s13, %s5258_s1 }
  0x21   : > { %p3947_p6 = scmp.ne.s32.totalorder %s4364_s13, %s3946_s22  ;;  %p3953_p11 = scmp.lt.u32.totalorder %s3951_s12, %s3946_s22 }
  0x22   : > { %p3955_p13 = scmp.lt.u32.totalorder %s3946_s22, %s4364_s13 }
  0x23   : > { %p3949_p8 = pnand %p4373_p7, %p3947_p6  ;;  %p3954_p12 = por %p3953_p11, %p3952_p10 }
  0x25   : > { %p3950_p9 = pneg %p3949_p8  ;;  %p3956_p0 = por %p3955_p13, %p3954_p12 }
  0x27   : > { %p3957_p1 = pnand %p3956_p0, %p3950_p9 }
  0x29   : > { %3960 = shalt.err (!%p3957_p1)
}
  0x2a   : > { %s3961_s16 = scalar_lea.vmem %s4366_s15, 3072  ;;  %s4232_s29 = smov [#allocation6]  }
  0x2b   : > { %p3962_p2 = scmp.ne.s32.totalorder %s4366_s15, %s3961_s16  ;;  %s3966_s30 = sshll.u32 %s4232_s29, 4  ;;  %s3967_s30 = int_to_ptr.vmem [resolvable:$false] %s3966_s30 }
  0x2c   : > { %s3968_s27 = scalar_lea.vmem %s3967_s30, 6144  ;;  %p3969_p6 = scmp.lt.s32.totalorder %s4366_s15, %s3967_s30 }
  0x2d   : > { %p3964_p3 = pnand %p3962_p2, %p4373_p7  ;;  %p3970_p8 = scmp.lt.s32.totalorder %s3968_s27, %s3961_s16 }
  0x2f   : > { %p3965_p4 = pneg %p3964_p3  ;;  %p3971_p10 = por %p3970_p8, %p3969_p6 }
  0x31   : > { %p3972_p11 = pnand %p3971_p10, %p3965_p4 }
  0x33   : > { %3975 = shalt.err (!%p3972_p11)
}
  0x34   : > { %s4233_s22 = smov 192   ;;  %s4234_s12 = smov 12  }
  0x35   : > { %s5260_s14 = scalar_lea.sflag [#allocation7], %s4350_s25  ;;  %s3215_s29 = sshll.u32 %s4353_s26, 8 }
  0x36   : > { %3655 = dma.hbm_to_vmem [thread:$0]  (!%p4356_p5), %s4364_s13, 3072, %s4366_s15, %s5260_s14, %s4233_s22, %s4233_s22, %s4234_s12  }
  0x37   : > { %s3360_s16 = sshll.u32 %s4230_s20, 12  ;;  %s5261_s3 = sld [smem:[#allocation25_spill]] }
  0x38   : > { %s405_s24 = scalar_lea.vmem [#allocation9], %s3215_s29  ;;  %s5239_s21 = scalar_lea.sflag [#allocation10], %s4350_s25 }
  0x39   : > { %s412_s19 = sshll.u32 %s405_s24, 4  ;;  %s4409_s19 = int_to_ptr.vmem [resolvable:$true] %s412_s19 }
  0x3d   : > { %s4405_s1 = scalar_lea.hbm %s5261_s3, %s3360_s16  ;;  %s3981_s22 = scalar_lea.hbm %s5261_s3, 8192 }
  0x3e   : > { %s3976_s11 = scalar_lea.hbm %s4405_s1, 4096  ;;  %p3982_p0 = scmp.lt.u32.totalorder %s4405_s1, %s5261_s3 }
  0x3f   : > { %p3977_p9 = scmp.ne.s32.totalorder %s4405_s1, %s3976_s11  ;;  %p3983_p1 = scmp.lt.u32.totalorder %s3981_s22, %s3976_s11 }
  0x40   : > { %p3985_p3 = scmp.lt.u32.totalorder %s3976_s11, %s4405_s1 }
  0x41   : > { %p3979_p12 = pnand %p3977_p9, %p4373_p7  ;;  %p3984_p2 = por %p3983_p1, %p3982_p0 }
  0x43   : > { %p3980_p13 = pneg %p3979_p12  ;;  %p3986_p4 = por %p3985_p3, %p3984_p2 }
  0x45   : > { %p3987_p6 = pnand %p3986_p4, %p3980_p13 }
  0x47   : > { %3990 = shalt.err (!%p3987_p6)
}
  0x48   : > { %s3991_s24 = scalar_lea.vmem %s4409_s19, 4096  ;;  %s4235_s30 = smov [#allocation9]  }
  0x49   : > { %p3992_p8 = scmp.ne.s32.totalorder %s4409_s19, %s3991_s24  ;;  %s3996_s27 = sshll.u32 %s4235_s30, 4  ;;  %s3997_s27 = int_to_ptr.vmem [resolvable:$false] %s3996_s27 }
  0x4a   : > { %s3998_s13 = scalar_lea.vmem %s3997_s27, 8192  ;;  %p3999_p9 = scmp.lt.s32.totalorder %s4409_s19, %s3997_s27 }
  0x4b   : > { %p3994_p10 = pnand %p3992_p8, %p4373_p7  ;;  %p4000_p12 = scmp.lt.s32.totalorder %s3998_s13, %s3991_s24 }
  0x4d   : > { %p3995_p11 = pneg %p3994_p10  ;;  %p4001_p0 = por %p4000_p12, %p3999_p9 }
  0x4f   : > { %p4002_p1 = pnand %p4001_p0, %p3995_p11 }
  0x51   : > { %4005 = shalt.err (!%p4002_p1)
}
  0x52   : > { %s4236_s11 = smov 256   ;;  %s4237_s15 = smov 16  }
  0x53   : > { %3661 = dma.hbm_to_vmem [thread:$0]  (!%p4356_p5), %s4405_s1, 4096, %s4409_s19, %s5239_s21, %s4236_s11, %s4236_s11, %s4237_s15  }
  0x54   : > { %s4440_s14 = scalar_lea.hbm %s5226_s4, %s3360_s16  ;;  %s426_s24 = scalar_lea.vmem [#allocation11], %s3215_s29 }
  0x55   : > { %s433_s30 = sshll.u32 %s426_s24, 4  ;;  %s3624_s27 = smul.u32 3, %s4353_s26  ;;  %s4444_s30 = int_to_ptr.vmem [resolvable:$true] %s433_s30 }
  0x56   : > { %s3625_s13 = smul.u32 48, %s4230_s20  ;;  %s4449_s3 = sadd.s32 4294967295, %s4230_s20  }
  0x57   : > { %s5262_s6 = sld [smem:[#allocation26_spill]]  ;;  %s454_s19 = scalar_lea.vmem [#allocation12], %s3624_s27 }
  0x58   : > { %s462_s16 = sshll.u32 %s454_s19, 4  ;;  %s5238_s29 = scalar_lea.sflag [#allocation13], %s4350_s25  ;;  %s4456_s16 = int_to_ptr.vmem [resolvable:$true] %s462_s16 }
  0x5d   : > { %s4454_s1 = scalar_lea.hbm %s5262_s6, %s3625_s13  ;;  %s4011_s8 = scalar_lea.hbm %s5262_s6, 96 }
  0x5e   : > { %s4006_s11 = scalar_lea.hbm %s4454_s1, 48  ;;  %p4012_p6 = scmp.lt.u32.totalorder %s4454_s1, %s5262_s6 }
  0x5f   : > { %p4007_p2 = scmp.ne.s32.totalorder %s4454_s1, %s4006_s11  ;;  %p4013_p8 = scmp.lt.u32.totalorder %s4011_s8, %s4006_s11 }
  0x60   : > { %p4015_p11 = scmp.lt.u32.totalorder %s4006_s11, %s4454_s1 }
  0x61   : > { %p4009_p3 = pnand %p4007_p2, %p4373_p7  ;;  %p4014_p10 = por %p4013_p8, %p4012_p6 }
  0x63   : > { %p4010_p4 = pneg %p4009_p3  ;;  %p4016_p9 = por %p4015_p11, %p4014_p10 }
  0x65   : > { %p4017_p12 = pnand %p4016_p9, %p4010_p4 }
  0x67   : > { %4020 = shalt.err (!%p4017_p12)
}
  0x68   : > { %s4021_s24 = scalar_lea.vmem %s4456_s16, 48  ;;  %s4238_s27 = smov [#allocation12]  }
  0x69   : > { %p4022_p0 = scmp.ne.s32.totalorder %s4456_s16, %s4021_s24  ;;  %s4026_s13 = sshll.u32 %s4238_s27, 4  ;;  %s4027_s13 = int_to_ptr.vmem [resolvable:$false] %s4026_s13 }
  0x6a   : > { %s4028_s19 = scalar_lea.vmem %s4027_s13, 96  ;;  %p4029_p3 = scmp.lt.s32.totalorder %s4456_s16, %s4027_s13 }
  0x6b   : > { %p4024_p1 = pnand %p4022_p0, %p4373_p7  ;;  %p4030_p13 = scmp.lt.s32.totalorder %s4028_s19, %s4021_s24 }
  0x6d   : > { %p4025_p2 = pneg %p4024_p1  ;;  %p4031_p6 = por %p4030_p13, %p4029_p3 }
  0x6f   : > { %p4032_p8 = pnand %p4031_p6, %p4025_p2 }
  0x71   : > { %4035 = shalt.err (!%p4032_p8)
}
  0x72   : > { %3667 = dma.hbm_to_vmem [thread:$0]  (!%p4356_p5), %s4454_s1, 48, %s4456_s16, %s5238_s29  }
  0x73   : > { %p5240_p13 = scmp.eq.s32.totalorder %s4449_s3, 0  ;;  %p3208_p4 = scmp.ge.s32.totalorder %s4230_s20, 1 }
  0x74   : > { %p324_p10 = scmp.lt.s32.totalorder %s4230_s20, 3  ;;  %p5263_p9 = scmp.ne.s32.totalorder %s4222_s18, %s4218_s17 }
  0x75   : > { %s4239_s22 = smov [#allocation3]   ;;  %s3212_s1 = sshll.u32 %s4353_s26, 6 }
  0x76   : > { %p4493_p12 = por %p5240_p13, %p5263_p9  ;;  %p4497_p0 = pnand %p3208_p4, %p324_p10 }
  0x77   : > { %s336_s8 = sshll.u32 %s4239_s22, 4  ;;  %s3359_s16 = sshll.u32 %s4230_s20, 10  ;;  %s4501_s8 = int_to_ptr.vmem [resolvable:$true] %s336_s8 }
  0x78   : > { %s5264_s11 = scalar_select %p4493_p12, 1, 0 }
  0x79   : > { %s5265_s15 = scalar_select %p4497_p0, 1, 0 }
  0x7a   : > { %p3648_p1 = pneg %p4497_p0  ;;  %s4516_s24 = scalar_lea.hbm %s5224_s2, %s3359_s16 }
  0x7b   : > { %s384_s27 = scalar_lea.vmem [#allocation8], %s3212_s1  ;;  %s4036_s29 = scalar_lea.hbm %s5222_s0, 256 }
  0x7c   : > { %p4509_p2 = pnand %p3648_p1, %p5240_p13  ;;  %s391_s13 = sshll.u32 %s384_s27, 4  ;;  %s4518_s13 = int_to_ptr.vmem [resolvable:$true] %s391_s13 }
  0x7d   : > { %p4037_p3 = scmp.ne.s32.totalorder %s5222_s0, %s4036_s29  ;;  %p4043_p10 = scmp.lt.u32.totalorder %s4036_s29, %s5222_s0 }
  0x7e   : > { %p4038_p6 = pneg %p4509_p2 }
  0x80   : > { %p4039_p8 = pnand %p4038_p6, %p4037_p3 }
  0x82   : > { %p4040_p4 = pneg %p4039_p8 }
  0x84   : > { %p4045_p9 = pnand %p4043_p10, %p4040_p4 }
  0x86   : > { %4048 = shalt.err (!%p4045_p9)
}
  0x87   : > { %s4049_s1 = scalar_lea.vmem %s4501_s8, 256  ;;  %p4057_p12 = scmp.lt.s32.totalorder %s4501_s8, %s4501_s8 }
  0x88   : > { %p4050_p1 = scmp.ne.s32.totalorder %s4501_s8, %s4049_s1  ;;  %p4058_p0 = scmp.lt.s32.totalorder %s4049_s1, %s4049_s1 }
  0x8a   : > { %p4052_p11 = pnand %p4050_p1, %p4038_p6  ;;  %p4059_p5 = por %p4058_p0, %p4057_p12 }
  0x8c   : > { %p4053_p13 = pneg %p4052_p11 }
  0x8e   : > { %p4060_p7 = pnand %p4059_p5, %p4053_p13 }
  0x90   : > { %4063 = shalt.err (!%p4060_p7)
}
  0x91   : > { %s4240_s6 = smov 128   ;;  %s4241_s21 = smov 8  }
  0x92   : > { %3651 = dma.hbm_to_vmem [thread:$0]  (!%p4509_p2), %s5222_s0, 256, %s4501_s8, [#allocation4], %s4240_s6, %s4240_s6, %s4241_s21  }
  0x93   : > { %s4064_s27 = scalar_lea.hbm %s4516_s24, 1024  ;;  %p5267_p3 = scmp.ne.s32.totalorder %s5259_s23, 0 }
  0x94   : > { %p4065_p11 = scmp.ne.s32.totalorder %s4516_s24, %s4064_s27  ;;  %s4069_s10 = scalar_lea.hbm %s5224_s2, 2048 }
  0x95   : > { %p4070_p7 = scmp.lt.u32.totalorder %s4516_s24, %s5224_s2  ;;  %p4071_p13 = scmp.lt.u32.totalorder %s4069_s10, %s4064_s27 }
  0x96   : > { %p4067_p12 = pnand %p4065_p11, %p5267_p3  ;;  %p4073_p6 = scmp.lt.u32.totalorder %s4064_s27, %s4516_s24 }
  0x97   : > { %p4072_p0 = por %p4071_p13, %p4070_p7 }
  0x98   : > { %p4068_p5 = pneg %p4067_p12 }
  0x99   : > { %p4074_p8 = por %p4073_p6, %p4072_p0 }
  0x9b   : > { %p4075_p4 = pnand %p4074_p8, %p4068_p5 }
  0x9d   : > { %4078 = shalt.err (!%p4075_p4)
}
  0x9e   : > { %s4079_s8 = scalar_lea.vmem %s4518_s13, 1024  ;;  %s4242_s17 = smov [#allocation8]  }
  0x9f   : > { %p4080_p2 = scmp.ne.s32.totalorder %s4518_s13, %s4079_s8  ;;  %s4084_s6 = sshll.u32 %s4242_s17, 4  ;;  %s4085_s6 = int_to_ptr.vmem [resolvable:$false] %s4084_s6 }
  0xa0   : > { %s4086_s21 = scalar_lea.vmem %s4085_s6, 2048  ;;  %p4087_p1 = scmp.lt.s32.totalorder %s4518_s13, %s4085_s6 }
  0xa1   : > { %p4082_p10 = pnand %p4080_p2, %p5267_p3  ;;  %p4088_p11 = scmp.lt.s32.totalorder %s4086_s21, %s4079_s8 }
  0xa3   : > { %p4083_p9 = pneg %p4082_p10  ;;  %p4089_p12 = por %p4088_p11, %p4087_p1 }
  0xa5   : > { %p4090_p7 = pnand %p4089_p12, %p4083_p9 }
  0xa7   : > { %4093 = shalt.err (!%p4090_p7)
}
  0xa8   : > { %s4243_s29 = smov 64   ;;  %s4244_s16 = smov 4  }
  0xa9   : > { %p5268_p5 = scmp.ne.s32.totalorder %s5257_s28, 0  ;;  %s5269_s27 = scalar_lea.sflag [#allocation7], %s4350_s25 }
  0xaa   : > { %s4094_s19 = scalar_lea.hbm %s4440_s14, 4096  ;;  %s4099_s12 = scalar_lea.hbm %s5226_s4, 8192 }
  0xab   : > { %3658 = dma.hbm_to_vmem [thread:$0]  (!%p5268_p5), %s4516_s24, 1024, %s4518_s13, %s5269_s27, %s4243_s29, %s4243_s29, %s4244_s16  }
  0xac   : > { %p4095_p13 = scmp.ne.s32.totalorder %s4440_s14, %s4094_s19  ;;  %p4100_p8 = scmp.lt.u32.totalorder %s4440_s14, %s5226_s4 }
  0xad   : > { %p4101_p4 = scmp.lt.u32.totalorder %s4099_s12, %s4094_s19  ;;  %p4103_p10 = scmp.lt.u32.totalorder %s4094_s19, %s4440_s14 }
  0xae   : > { %p4097_p0 = pnand %p4095_p13, %p5267_p3 }
  0xaf   : > { %p4102_p2 = por %p4101_p4, %p4100_p8 }
  0xb0   : > { %p4098_p6 = pneg %p4097_p0 }
  0xb1   : > { %p4104_p9 = por %p4103_p10, %p4102_p2 }
  0xb3   : > { %p4105_p1 = pnand %p4104_p9, %p4098_p6 }
  0xb5   : > { %4108 = shalt.err (!%p4105_p1)
}
  0xb6   : > { %s4109_s24 = scalar_lea.vmem %s4444_s30, 4096  ;;  %s4245_s13 = smov [#allocation11]  }
  0xb7   : > { %p4110_p11 = scmp.ne.s32.totalorder %s4444_s30, %s4109_s24  ;;  %s4114_s17 = sshll.u32 %s4245_s13, 4  ;;  %s4115_s17 = int_to_ptr.vmem [resolvable:$false] %s4114_s17 }
  0xb8   : > { %s4116_s6 = scalar_lea.vmem %s4115_s17, 8192  ;;  %p4117_p13 = scmp.lt.s32.totalorder %s4444_s30, %s4115_s17 }
  0xb9   : > { %p4112_p12 = pnand %p4110_p11, %p5267_p3  ;;  %p4118_p0 = scmp.lt.s32.totalorder %s4116_s6, %s4109_s24 }
  0xbb   : > { %p4113_p7 = pneg %p4112_p12  ;;  %p4119_p8 = por %p4118_p0, %p4117_p13 }
  0xbd   : > { %p4120_p4 = pnand %p4119_p8, %p4113_p7 }
  0xbf   : > { %4123 = shalt.err (!%p4120_p4)
}
  0xc0   : > { %s5270_s21 = scalar_lea.sflag [#allocation10], %s4350_s25  ;;  %s3222_s27 = sshll.u32 %s4353_s26, 2 }
  0xc1   : > { %3664 = dma.hbm_to_vmem [thread:$0]  (!%p5268_p5), %s4440_s14, 4096, %s4444_s30, %s5270_s21, %s4243_s29, %s4243_s29, %s4244_s16  }
  0xc2   : > { %s3362_s19 = sshll.u32 %s4230_s20, 6  ;;  %s473_s1 = scalar_lea.vmem [#allocation14], %s3222_s27 }
  0xc3   : > { %s4598_s12 = scalar_lea.hbm %s5229_s7, %s3362_s19  ;;  %s481_s8 = sshll.u32 %s473_s1, 4  ;;  %s482_s8 = int_to_ptr.vmem [resolvable:$true] %s481_s8 }
  0xc4   : > { %s4124_s24 = scalar_lea.hbm %s4598_s12, 64  ;;  %s4129_s20 = scalar_lea.hbm %s5229_s7, 128 }
  0xc5   : > { %p4125_p6 = scmp.ne.s32.totalorder %s4598_s12, %s4124_s24  ;;  %p4130_p9 = scmp.lt.u32.totalorder %s4598_s12, %s5229_s7 }
  0xc6   : > { %p4131_p1 = scmp.lt.u32.totalorder %s4129_s20, %s4124_s24  ;;  %p4133_p12 = scmp.lt.u32.totalorder %s4124_s24, %s4598_s12 }
  0xc7   : > { %p4127_p2 = pnand %p4125_p6, %p5267_p3 }
  0xc8   : > { %p4132_p11 = por %p4131_p1, %p4130_p9 }
  0xc9   : > { %p4128_p10 = pneg %p4127_p2 }
  0xca   : > { %p4134_p7 = por %p4133_p12, %p4132_p11 }
  0xcc   : > { %p4135_p13 = pnand %p4134_p7, %p4128_p10 }
  0xce   : > { %4138 = shalt.err (!%p4135_p13)
}
  0xcf   : > { %s4139_s16 = scalar_lea.vmem %s482_s8, 64  ;;  %s4246_s13 = smov [#allocation14]  }
  0xd0   : > { %p4140_p0 = scmp.ne.s32.totalorder %s482_s8, %s4139_s16  ;;  %s4144_s17 = sshll.u32 %s4246_s13, 4  ;;  %s4145_s17 = int_to_ptr.vmem [resolvable:$false] %s4144_s17 }
  0xd1   : > { %s4146_s6 = scalar_lea.vmem %s4145_s17, 128  ;;  %p4147_p6 = scmp.lt.s32.totalorder %s482_s8, %s4145_s17 }
  0xd2   : > { %p4142_p8 = pnand %p4140_p0, %p5267_p3  ;;  %p4148_p2 = scmp.lt.s32.totalorder %s4146_s6, %s4139_s16 }
  0xd4   : > { %p4143_p4 = pneg %p4142_p8  ;;  %p4149_p5 = por %p4148_p2, %p4147_p6 }
  0xd6   : > { %p4150_p1 = pnand %p4149_p5, %p4143_p4 }
  0xd8   : > { %4153 = shalt.err (!%p4150_p1)
}
  0xd9   : > { %p5271_p9 = scmp.ne.s32.totalorder %s5257_s28, 0  ;;  %s5272_s21 = scalar_lea.sflag [#allocation13], %s4350_s25 }
  0xda   : > { %p5273_p10 = scmp.ne.s32.totalorder %s5265_s15, 0 }
  0xdb   : > { %3670 = dma.hbm_to_vmem [thread:$0]  (!%p5271_p9), %s4598_s12, 64, %s482_s8, %s5272_s21  }
  0xdc   : > { %490 = sbr.rel (%p5273_p10) target bundleno = 3872 (0xf20), region = 64  ;;  %p5274_p3 = scmp.eq.s32.totalorder (!%p5273_p10), %s4449_s3, 0 }
  0xe3   : > { %4197 = dma.done.wait (%p5274_p3), [#allocation4], 256   ;;  %p5275_p11 = pmov %p5274_p3 }
  0xe4   : > { %s496_s23 = sand.u32 1, %s4449_s3   ;;  %s498_s27 = sand.u32 1, %s4222_s18  }
  0xe5   : > { %4199 = vsyncadd (%p5275_p11), [#allocation4], 4294967040  ;;  %s3626_s19 = smul.u32 192, %s498_s27  ;;  %s497_s28 = scalar_lea.sflag [#allocation7], %s496_s23 }
  0xe6   : > { %p5276_p5 = scmp.ne.s32.totalorder %s5264_s11, 0 }
  0xe7   : > { %s4627_s22 = scalar_lea.vmem [#allocation6], %s3626_s19 }
  0xe8   : > { %4201 = dma.done.wait (%p5276_p5), %s497_s28, 4096  }
  0xe9   : > { %4203 = vsyncadd (%p5276_p5), %s497_s28, 4294963200  ;;  %s3227_s25 = sshll.u32 %s498_s27, 6  ;;  %s3228_s15 = sshll.u32 %s498_s27, 8 }
  0xea   : > { %s4633_s10 = scalar_lea.vmem [#allocation8], %s3227_s25  ;;  %s515_s12 = scalar_lea.sflag [#allocation10], %s496_s23 }
  0xeb   : > { %s4635_s1 = scalar_lea.vmem [#allocation9], %s3228_s15 }
  0xec   : > { %4205 = dma.done.wait (%p5276_p5), %s515_s12, 8192  }
  0xed   : > { %4207 = vsyncadd (%p5276_p5), %s515_s12, 4294959104  ;;  %s3627_s8 = smul.u32 3, %s498_s27  ;;  %s4641_s24 = scalar_lea.vmem [#allocation11], %s3228_s15 }
  0xee   : > { %s533_s14 = scalar_lea.sflag [#allocation13], %s496_s23 }
  0xef   : > { %s4643_s26 = scalar_lea.vmem [#allocation12], %s3627_s8 }
  0xf0   : > { %4209 = dma.done.wait (%p5276_p5), %s533_s14, 112  }
  0xf1   : > { %4211 = vsyncadd (%p5276_p5), %s533_s14, 4294967184  ;;  %s3230_s20 = sshll.u32 %s498_s27, 2  ;;  %p608_p12 = scmp.lt.s32.totalorder %s4449_s3, 1 }
  0xf2   : > { %s4656_s6 = scalar_lea.vmem [#allocation14], %s3230_s20  ;;  %p5277_p7 = scmp.ne.s32.totalorder %s4449_s3, 0 }
  0xf3   : > { %s609_s30 = scalar_select %p608_p12, %s4449_s3, 1 }
  0xf4   : > { %616 = sbr.rel (%p5277_p7) target bundleno = 251 (0xfb), region = 96  ;;  %v617_v0 = vld [vmem:[#allocation3] sm:$0xff] (!%p5277_p7)  ;;  %v618_v1 = vld [vmem:[#allocation3 + $0x8] sm:$0xff] (!%p5277_p7) }
  0xf5   : > { %s3231_s29 = sshll.u32 %s609_s30, 3  ;;  %619 = vst [vmem:[#allocation2] sm:$0xff] (!%p5277_p7), %v617_v0  ;;  %620 = vst [vmem:[#allocation2 + $0x8] sm:$0xff] (!%p5277_p7), %v618_v1 }
  0xf6   : > { %s4654_s17 = scalar_lea.vmem %s5227_s5, %s3231_s29 }
  0xfb PF: > { %v3741_v4 = vld [vmem:[%s4627_s22 + $0x4] ss:$12 sps:$4 sm:$0xff]   ;;  %v3743_v5 = vld [vmem:[%s4627_s22] ss:$12 sps:$4 sm:$0xff]   ;;  %v4247_v6 = vmov 0.0   ;;  %v4248_v32 = vmov 0   ;;  %v647_v42 = vlaneseq }
  0xfc   : > { %v621_v2 = vld [vmem:[#allocation2] sm:$0xff]  ;;  %v622_v3 = vld [vmem:[#allocation2 + $0x8] sm:$0xff]  ;;  %3466 = vmatprep.subr.bf16.mxu1 %v4247_v6  ;;  %837 = vmatprep.subr.bf16.mxu0 %v3741_v4  ;;  %v3751_v20 = vld [vmem:[%s4627_s22 + $0x30] ss:$12 sps:$4 sm:$0xff]   ;;  %vm4249_vm0 = vmmov 0   ;;  %vm929_vm1 = vcmask 261120  }
  0xfd   : > { %624 = vadd.xlane.f32.xlu0 %v621_v2  ;;  %v3744_v7 = vld [vmem:[%s4627_s22 + $0x8] ss:$12 sps:$4 sm:$0xff]   ;;  %838 = vmatpush1.bf16.msra.mxu0 %v3743_v5  ;;  %v3747_v17 = vld [vmem:[%s4627_s22 + $0x18] ss:$12 sps:$4 sm:$0xff]   ;;  %v3748_v18 = vld [vmem:[%s4627_s22 + $0x20] ss:$12 sps:$4 sm:$0xff]  }
  0xfe   : > { %v3745_v8 = vld [vmem:[%s4627_s22 + $0x1c] ss:$12 sps:$4 sm:$0xff]   ;;  %3467 = vmatpush3.bf16.msra.mxu1 %v3744_v7  ;;  %v3749_v19 = vld [vmem:[%s4627_s22 + $0x34] ss:$12 sps:$4 sm:$0xff]   ;;  %v3752_v21 = vld [vmem:[%s4627_s22 + $0x38] ss:$12 sps:$4 sm:$0xff]   ;;  %869 = vmatprep.mubr.bf16.mxu0 %v4248_v32 }
  0xff   : > { %839 = vmatprep.subr.bf16.mxu0 %v3745_v8  ;;  %3468 = vmatprep.subr.bf16.mxu1 %v4247_v6  ;;  %v3753_v22 = vld [vmem:[%s4627_s22 + $0x4c] ss:$12 sps:$4 sm:$0xff]   ;;  %v3755_v23 = vld [vmem:[%s4627_s22 + $0x48] ss:$12 sps:$4 sm:$0xff]   ;;  %v3756_v24 = vld [vmem:[%s4627_s22 + $0x50] ss:$12 sps:$4 sm:$0xff]  }
 0x100   : > { %v3757_v25 = vld [vmem:[%s4627_s22 + $0x64] ss:$12 sps:$4 sm:$0xff]   ;;  %v3759_v26 = vld [vmem:[%s4627_s22 + $0x60] ss:$12 sps:$4 sm:$0xff]   ;;  %v3760_v27 = vld [vmem:[%s4627_s22 + $0x68] ss:$12 sps:$4 sm:$0xff]   ;;  %3482 = vmatprep.mubr.msk.bf16.mxu1 %vm4249_vm0, %v4247_v6 }
 0x101   : > { %626 = vadd.xlane.f32.xlu0 %v622_v3  ;;  %840 = vmatpush1.bf16.msra.mxu0 %v3747_v17  ;;  %v3761_v28 = vld [vmem:[%s4627_s22 + $0x7c] ss:$12 sps:$4 sm:$0xff]   ;;  %v3763_v29 = vld [vmem:[%s4627_s22 + $0x78] ss:$12 sps:$4 sm:$0xff]   ;;  %v3764_v30 = vld [vmem:[%s4627_s22 + $0x80] ss:$12 sps:$4 sm:$0xff]  }
 0x102   : > { %3469 = vmatpush3.bf16.msra.mxu1 %v3748_v18  ;;  %841 = vmatprep.subr.bf16.mxu0 %v3749_v19  ;;  %v3765_v31 = vld [vmem:[%s4627_s22 + $0x94] ss:$12 sps:$4 sm:$0xff]   ;;  %v3767_v33 = vld [vmem:[%s4627_s22 + $0x90] ss:$12 sps:$4 sm:$0xff]   ;;  %v3768_v34 = vld [vmem:[%s4627_s22 + $0x98] ss:$12 sps:$4 sm:$0xff]  }
 0x103   : > { %3470 = vmatprep.subr.bf16.mxu1 %v4247_v6  ;;  %v3769_v35 = vld [vmem:[%s4627_s22 + $0xac] ss:$12 sps:$4 sm:$0xff]   ;;  %v3771_v36 = vld [vmem:[%s4627_s22 + $0xa8] ss:$12 sps:$4 sm:$0xff]   ;;  %v3772_v37 = vld [vmem:[%s4627_s22 + $0xb0] ss:$12 sps:$4 sm:$0xff]  }
 0x104   : > { %v4705_v45 = vshrl.u32 %v647_v42, 7  ;;  %v4711_v47 = vld [vmem:[%s4654_s17] sm:$0x3f]  ;;  %vm994_vm2 = vcmask 1043456   ;;  %vm978_vm4 = vcmask 64512   ;;  %s4250_s11 = smov 96  }
 0x105   : > { %842 = vmatpush1.bf16.msra.mxu0 %v3751_v20  ;;  %v692_v60 = vld [vmem:[%s4643_s26] sm:$0x7]  ;;  %s4251_s21 = smov 32   ;;  %s4252_s23 = smov 64   ;;  %vm1390_vm5 = vcmask 523264   ;;  %vm1392_vm6 = vcmask 785408  }
 0x106   : > { %3471 = vmatpush3.bf16.msra.mxu1 %v3752_v21  ;;  %843 = vmatprep.subr.bf16.mxu0 %v3753_v22  ;;  %v4708_v46 = vsub.s32 0, %v4705_v45  ;;  %v4717_v51 = vsub.s32 1, %v4705_v45  ;;  %v4728_v61 = vsub.s32 2, %v4705_v45  ;;  %v924_v21 = vand.u32 127, %v647_v42  ;;  %p3345_p13 = scmp.ne.s32.totalorder %s4449_s3, 1 }
 0x107   : > { %3472 = vmatprep.subr.bf16.mxu1 %v4247_v6  ;;  %vm2880_vm15 = vcmask (!%p3345_p13), 1040384  }
 0x108   : > { %v650_v50 = vrot.slane %v4711_v47, %v4708_v46  ;;  %v656_v55 = vrot.slane %v4711_v47, %v4717_v51  ;;  %v701_v62 = vrot.slane %v692_v60, %v4717_v51  ;;  %v697_v1 = vrot.slane %v692_v60, %v4708_v46 }
 0x109   : > { %844 = vmatpush1.bf16.msra.mxu0 %v3755_v23  ;;  %vm4746_vm3 = vcmp.le.s32.totalorder %v924_v21, %v4705_v45 }
 0x10a   : > { %3473 = vmatpush3.bf16.msra.mxu1 %v3756_v24  ;;  %845 = vmatprep.subr.bf16.mxu0 %v3757_v25 }
 0x10b   : > { %3474 = vmatprep.subr.bf16.mxu1 %v4247_v6 }
 0x10d   : > { %846 = vmatpush1.bf16.msra.mxu0 %v3759_v26 }
 0x10e   : > { %3475 = vmatpush3.bf16.msra.mxu1 %v3760_v27  ;;  %847 = vmatprep.subr.bf16.mxu0 %v3761_v28 }
 0x10f   : > { %3476 = vmatprep.subr.bf16.mxu1 %v4247_v6 }
 0x111   : > { %848 = vmatpush1.bf16.msra.mxu0 %v3763_v29 }
 0x112   : > { %3477 = vmatpush3.bf16.msra.mxu1 %v3764_v30  ;;  %849 = vmatprep.subr.bf16.mxu0 %v3765_v31 }
 0x113   : > { %3478 = vmatprep.subr.bf16.mxu1 %v4247_v6 }
 0x115   : > { %850 = vmatpush1.bf16.msra.mxu0 %v3767_v33 }
 0x116   : > { %3479 = vmatpush3.bf16.msra.mxu1 %v3768_v34  ;;  %851 = vmatprep.subr.bf16.mxu0 %v3769_v35 }
 0x117   : > { %3480 = vmatprep.subr.bf16.mxu1 %v4247_v6 }
 0x119   : > { %852 = vmatpush1.bf16.msra.mxu0 %v3771_v36 }
 0x11a   : > { %3481 = vmatpush3.bf16.msra.mxu1 %v3772_v37  ;;  %3510 = vmatprep.subr.bf16.mxu0 %v4247_v6 }
 0x11b   : > { %3486 = vmatprep.subr.bf16.mxu1 %v4247_v6 }
 0x18a   : > { %v625_v9 = vpop.xlane.xlu0 %624 }
 0x18b   : > { %v629_v10 = vmul.f32 0.0078125, %v625_v9 }
 0x18d   : > { %v4666_v11 = vsub.f32 %v621_v2, %v629_v10  ;;  %v705_v2 = vrot.slane %v692_v60, %v4728_v61 }
 0x18e   : > { %v627_v12 = vpop.xlane.xlu0 %626 }
 0x18f   : > { %v630_v13 = vmul.f32 0.0078125, %v627_v12  ;;  %v633_v14 = vmul.f32 %v4666_v11, %v4666_v11 }
 0x191   : > { %v4670_v15 = vsub.f32 %v622_v3, %v630_v13  ;;  %635 = vadd.xlane.f32.xlu1 %v633_v14 }
 0x193   : > { %v634_v16 = vmul.f32 %v4670_v15, %v4670_v15 }
 0x195   : > { %637 = vadd.xlane.f32.xlu1 %v634_v16 }
 0x21e   : > { %v636_v38 = vpop.xlane.xlu1 %635 }
 0x21f   : > { %v639_v39 = vmul.f32 0.0078125, %v636_v38 }
 0x221   : > { %v641_v40 = vadd.f32 1e-05, %v639_v39 }
 0x222   : > { %v638_v41 = vpop.xlane.xlu1 %637 }
 0x223   : > { %3861 = vrsqrt.f32 %v641_v40  ;;  %v640_v43 = vmul.f32 0.0078125, %v638_v41 }
 0x225   : > { %v642_v44 = vadd.f32 1e-05, %v640_v43 }
 0x227   : > { %3863 = vrsqrt.f32 %v642_v44 }
 0x22d   : > { %v3862_v48 = vpop.eup %3861 }
 0x22e   : > { %v645_v49 = vmul.f32 %v3862_v48, %v4666_v11 }
 0x230   : > { %v651_v54 = vmul.f32 %v650_v50, %v645_v49 }
 0x231   : > { %v3864_v52 = vpop.eup %3863 }
 0x232   : > { %v646_v53 = vmul.f32 %v3864_v52, %v4670_v15  ;;  %v657_v57 = vadd.f32 %v656_v55, %v651_v54 }
 0x234   : > { %v652_v56 = vmul.f32 %v650_v50, %v646_v53 }
 0x236   : > { %v658_v58 = vadd.f32 %v656_v55, %v652_v56 }
 0x238   : > { %v659_v59 = vpack.c.bf16 %v658_v58, %v657_v57 }
 0x23a   : > { %870 = vmatmul.mubr.bf16.vlgmr.msra.gmra.mrb[0].mxu0 %v659_v59  ;;  %3483 = vmatmul.mubr.bf16.vlgmr.msra.gmra.mrb[0].mxu1 %v659_v59 }
 0x23b   : > { %3488 = vmatprep.mubr.msk.bf16.mxu1 %vm4249_vm0, %v4247_v6  ;;  %3512 = vmatprep.mubr.msk.bf16.mxu0 %vm4249_vm0, %v4247_v6 }
 0x30d   : > { %v871_v63 = vpop.f32.mrb[0].mxu0  ;;  %v914_v0 = vpop.f32.mrb[0].mxu1 }
 0x30e   : > { %v873_v3 = vpop.f32.mrb[1].mxu0  ;;  %v3484_v4 = vpop.f32.mrb[1].mxu1  ;;  %v915_v15 = vadd.f32 %v914_v0, %v705_v2  ;;  %v872_v17 = vadd.f32 %v871_v63, %v697_v1 }
 0x30f   : > { %v874_v5 = vadd.f32 %v873_v3, %v701_v62  ;;  %v875_v7 = vpop.f32.mrb[2].mxu0  ;;  %v917_v8 = vpop.f32.mrb[2].mxu1 }
 0x310   : > { %v876_v9 = vadd.f32 %v875_v7, %v697_v1  ;;  %v4733_v10 = vadd.f32 %v917_v8, %v705_v2  ;;  %v877_v11 = vpop.f32.mrb[3].mxu0  ;;  %v3485_v12 = vpop.f32.mrb[3].mxu1  ;;  %v4737_v18 = vpack.c.bf16 %v915_v15, %v915_v15  ;;  %v928_v19 = vpack.c.bf16 %v872_v17, %v872_v17 }
 0x311   : > { %v926_v13 = vpack.c.bf16 %v874_v5, %v874_v5  ;;  %v878_v14 = vadd.f32 %v877_v11, %v701_v62 }
 0x312   : > { %v996_v20 = vsel %vm994_vm2, %v4737_v18, 0  ;;  %v1396_v37 = vpack.c.bf16 %v876_v9, %v876_v9 }
 0x313   : > { %v934_v16 = vsel %vm929_vm1, %v926_v13, 0  ;;  %v1394_v30 = vpack.c.bf16 %v878_v14, %v878_v14 }
 0x314   : > { %3487 = vmatpush3.bf16.xpose.msra.mxu1 %v934_v16 }
 0x315   : > { %3492 = vmatprep.subr.bf16.mxu1 %v4247_v6  ;;  %v1401_v55 = vsel %vm929_vm1, %v1394_v30, 0 }
 0x31b   : > { %3489 = vmatmul.mubr.msk.bf16.vlgmr.msra.gmra.mrb[4].mxu1 %vm929_vm1, %v928_v19 }
 0x31c   : > { %3493 = vmatpush3.bf16.msra.mxu1 %v996_v20  ;;  %3494 = vmatprep.mubr.msk.bf16.mxu1 %vm4249_vm0, %v4247_v6 }
 0x31d   : > { %3498 = vmatprep.subr.bf16.mxu1 %v4247_v6 }
 0x3ee   : > { %v970_v22 = vpop.f32.mrb[4].mxu1 }
 0x3ef   : > { %v976_v24 = vmul.f32 0.17677669, %v970_v22  ;;  %v3490_v25 = vpop.f32.mrb[5].mxu1 }
 0x3f0   : > { %v973_v26 = vpop.f32.mrb[6].mxu1 }
 0x3f1   : > { %v3491_v27 = vpop.f32.mrb[7].mxu1  ;;  %v977_v28 = vsel %vm4746_vm3, %v976_v24, -1e+30 }
 0x3f2   : > { %v979_v29 = vsel %vm978_vm4, %v977_v28, -inf }
 0x3f3   : > { %980 = vmax.xlane.f32.xlu0 %v979_v29 }
 0x409   : > { %1042 = vrot.lane.b32.xlu0 %v926_v13, %s4250_s11 }
 0x40d   : > { %1267 = vrot.lane.b32.xlu0 %v926_v13, %s4251_s21 }
 0x411   : > { %1507 = vrot.lane.b32.xlu0 %v1394_v30, %s4250_s11 }
 0x415   : > { %1620 = vrot.lane.b32.xlu0 %v1394_v30, %s4252_s23 }
 0x419   : > { %1732 = vrot.lane.b32.xlu0 %v1394_v30, %s4251_s21 }
 0x480   : > { %v981_v31 = vpop.xlane.xlu0 %980 }
 0x481   : > { %v982_v33 = vsub.f32 %v977_v28, %v981_v31 }
 0x483   : > { %v983_v34 = vmul.f32 1.442695, %v982_v33 }
 0x484   : > { %v1043_v40 = vpop.permute.xlu0 %1042 }
 0x485   : > { %3865 = vpow2.f32 %v983_v34  ;;  %v1048_v50 = vsel %vm929_vm1, %v1043_v40, 0 }
 0x488   : > { %v1268_v48 = vpop.permute.xlu0 %1267 }
 0x489   : > { %v1273_v53 = vsel %vm929_vm1, %v1268_v48, 0 }
 0x48c   : > { %v1508_v56 = vpop.permute.xlu0 %1507 }
 0x48d   : > { %v1513_v57 = vsel %vm929_vm1, %v1508_v56, 0 }
 0x48f   : > { %v3866_v35 = vpop.eup %3865 }
 0x490   : > { %v985_v36 = vsel %vm978_vm4, %v3866_v35, 0.0  ;;  %v1621_v58 = vpop.permute.xlu0 %1620 }
 0x491   : > { %986 = vadd.xlane.f32.xlu1 %v985_v36  ;;  %v1626_v60 = vsel %vm929_vm1, %v1621_v58, 0 }
 0x494   : > { %v1733_v62 = vpop.permute.xlu0 %1732 }
 0x495   : > { %v1738_v0 = vsel %vm929_vm1, %v1733_v62, 0 }
 0x4a2   : > { %1039 = vrot.lane.b32.xlu1 %v928_v19, %s4250_s11 }
 0x4a6   : > { %1155 = vrot.lane.b32.xlu1 %v926_v13, %s4252_s23 }
 0x4aa   : > { %1153 = vrot.lane.b32.xlu1 %v928_v19, %s4252_s23 }
 0x4ae   : > { %1265 = vrot.lane.b32.xlu1 %v928_v19, %s4251_s21 }
 0x4b2   : > { %1504 = vrot.lane.b32.xlu1 %v1396_v37, %s4250_s11 }
 0x4b6   : > { %1618 = vrot.lane.b32.xlu1 %v1396_v37, %s4252_s23 }
 0x4ba   : > { %1730 = vrot.lane.b32.xlu1 %v1396_v37, %s4251_s21 }
 0x51e   : > { %v987_v38 = vpop.xlane.xlu1 %986 }
 0x51f   : > { %3867 = vrcp.f32 %v987_v38 }
 0x522   : > { %v1040_v39 = vpop.permute.xlu1 %1039 }
 0x526   : > { %v1156_v41 = vpop.permute.xlu1 %1155 }
 0x527   : > { %v1161_v42 = vsel %vm929_vm1, %v1156_v41, 0 }
 0x528   : > { %3511 = vmatpush3.bf16.xpose.msra.mxu0 %v1161_v42 }
 0x529   : > { %v3868_v43 = vpop.eup %3867  ;;  %3522 = vmatprep.subr.bf16.mxu0 %v4247_v6 }
 0x52a   : > { %v989_v44 = vmul.f32 %v3868_v43, %v3866_v35  ;;  %v1154_v52 = vpop.permute.xlu1 %1153 }
 0x52c   : > { %v990_v49 = vpack.c.bf16 %v989_v44, %v989_v44 }
 0x52e   : > { %3495 = vmatmul.mubr.msk.bf16.vlgmr.msra.gmra.mrb[8].mxu1 %vm978_vm4, %v990_v49  ;;  %v1266_v54 = vpop.permute.xlu1 %1265 }
 0x52f   : > { %3499 = vmatpush3.bf16.xpose.msra.mxu1 %v1048_v50  ;;  %3513 = vmatmul.mubr.msk.bf16.vlgmr.msra.gmra.mrb[4].mxu0 %vm929_vm1, %v1154_v52 }
 0x530   : > { %3523 = vmatpush3.bf16.xpose.msra.mxu0 %v1273_v53  ;;  %3500 = vmatprep.mubr.msk.bf16.mxu1 %vm4249_vm0, %v4247_v6 }
 0x531   : > { %3524 = vmatprep.mubr.msk.bf16.mxu0 %vm4249_vm0, %v4247_v6  ;;  %3534 = vmatprep.subr.bf16.mxu0 %v4247_v6 }
 0x532   : > { %3504 = vmatprep.subr.bf16.mxu1 %v4247_v6  ;;  %v1505_v59 = vpop.permute.xlu1 %1504 }
 0x536   : > { %3501 = vmatmul.mubr.msk.bf16.vlgmr.msra.gmra.mrb[12].mxu1 %vm929_vm1, %v1040_v39  ;;  %v1619_v63 = vpop.permute.xlu1 %1618 }
 0x537   : > { %3525 = vmatmul.mubr.msk.bf16.vlgmr.msra.gmra.mrb[8].mxu0 %vm929_vm1, %v1266_v54  ;;  %3506 = vmatprep.mubr.msk.bf16.mxu1 %vm4249_vm0, %v4247_v6 }
 0x538   : > { %3535 = vmatpush3.bf16.xpose.msra.mxu0 %v1401_v55  ;;  %3536 = vmatprep.mubr.msk.bf16.mxu0 %vm4249_vm0, %v4247_v6 }
 0x539   : > { %3546 = vmatprep.subr.bf16.mxu0 %v4247_v6 }
 0x53a   : > { %v1731_v1 = vpop.permute.xlu1 %1730 }
 0x53f   : > { %3537 = vmatmul.mubr.msk.bf16.vlgmr.msra.gmra.mrb[12].mxu0 %vm929_vm1, %v1396_v37 }
 0x540   : > { %3547 = vmatpush3.bf16.xpose.msra.mxu0 %v1513_v57  ;;  %3548 = vmatprep.mubr.msk.bf16.mxu0 %vm4249_vm0, %v4247_v6 }
 0x541   : > { %3558 = vmatprep.subr.bf16.mxu0 %v4247_v6 }
 0x547   : > { %3549 = vmatmul.mubr.msk.bf16.vlgmr.msra.gmra.mrb[16].mxu0 %vm929_vm1, %v1505_v59 }
 0x548   : > { %3559 = vmatpush3.bf16.xpose.msra.mxu0 %v1626_v60  ;;  %3560 = vmatprep.mubr.msk.bf16.mxu0 %vm4249_vm0, %v4247_v6 }
 0x549   : > { %3570 = vmatprep.subr.bf16.mxu0 %v4247_v6 }
 0x54f   : > { %3561 = vmatmul.mubr.msk.bf16.vlgmr.msra.gmra.mrb[20].mxu0 %vm929_vm1, %v1619_v63 }
 0x550   : > { %3571 = vmatpush3.bf16.xpose.msra.mxu0 %v1738_v0  ;;  %3572 = vmatprep.mubr.msk.bf16.mxu0 %vm4249_vm0, %v4247_v6 }
 0x551   : > { %3582 = vmatprep.subr.bf16.mxu0 %v4247_v6 }
 0x557   : > { %3573 = vmatmul.mubr.msk.bf16.vlgmr.msra.gmra.mrb[24].mxu0 %vm929_vm1, %v1731_v1 }
 0x558   : > { %3598 = vmatprep.mubr.msk.bf16.mxu0 %vm4249_vm0, %v4247_v6 }
 0x601   : > { %v4804_v2 = vpop.f32.mrb[8].mxu1 }
 0x602   : > { %v3496_v3 = vpop.f32.mrb[9].mxu1  ;;  %v1197_v4 = vpop.f32.mrb[4].mxu0 }
 0x603   : > { %v1203_v5 = vmul.f32 0.17677669, %v1197_v4  ;;  %v1035_v7 = vpop.f32.mrb[10].mxu1  ;;  %v3514_v8 = vpop.f32.mrb[5].mxu0 }
 0x604   : > { %v3497_v9 = vpop.f32.mrb[11].mxu1  ;;  %v1200_v11 = vpop.f32.mrb[6].mxu0 }
 0x605   : > { %v3515_v12 = vpop.f32.mrb[7].mxu0  ;;  %v1204_v13 = vsel %vm4746_vm3, %v1203_v5, -1e+30 }
 0x606   : > { %v1205_v14 = vsel %vm978_vm4, %v1204_v13, -inf }
 0x607   : > { %1206 = vmax.xlane.f32.xlu1 %v1205_v14 }
 0x609   : > { %v1084_v15 = vpop.f32.mrb[12].mxu1 }
 0x60a   : > { %v1090_v16 = vmul.f32 0.17677669, %v1084_v15  ;;  %v3502_v17 = vpop.f32.mrb[13].mxu1  ;;  %v1309_v19 = vpop.f32.mrb[8].mxu0 }
 0x60b   : > { %v1315_v20 = vmul.f32 0.17677669, %v1309_v19  ;;  %v1087_v21 = vpop.f32.mrb[14].mxu1  ;;  %v3526_v22 = vpop.f32.mrb[9].mxu0 }
 0x60c   : > { %v3503_v24 = vpop.f32.mrb[15].mxu1  ;;  %v1312_v25 = vpop.f32.mrb[10].mxu0  ;;  %v1091_v26 = vsel %vm4746_vm3, %v1090_v16, -1e+30 }
 0x60d   : > { %v3527_v27 = vpop.f32.mrb[11].mxu0  ;;  %v1092_v28 = vsel %vm978_vm4, %v1091_v26, -inf  ;;  %v1316_v29 = vsel %vm4746_vm3, %v1315_v20, -1e+30 }
 0x60e   : > { %1093 = vmax.xlane.f32.xlu0 %v1092_v28  ;;  %v1317_v30 = vsel %vm978_vm4, %v1316_v29, -inf }
 0x612   : > { %v1437_v31 = vpop.f32.mrb[12].mxu0  ;;  %1318 = vmax.xlane.f32.xlu0 %v1317_v30 }
 0x613   : > { %v1443_v33 = vmul.f32 0.17677669, %v1437_v31  ;;  %v3538_v34 = vpop.f32.mrb[13].mxu0 }
 0x614   : > { %v1440_v35 = vpop.f32.mrb[14].mxu0 }
 0x615   : > { %v3539_v36 = vpop.f32.mrb[15].mxu0  ;;  %v1444_v37 = vsel %vm4746_vm3, %v1443_v33, -1e+30 }
 0x616   : > { %v1445_v38 = vsel %vm978_vm4, %v1444_v37, -inf }
 0x617   : > { %1446 = vmax.xlane.f32.xlu0 %v1445_v38 }
 0x61a   : > { %v1549_v39 = vpop.f32.mrb[16].mxu0 }
 0x61b   : > { %v1555_v40 = vmul.f32 0.17677669, %v1549_v39  ;;  %v3550_v41 = vpop.f32.mrb[17].mxu0 }
 0x61c   : > { %v1552_v42 = vpop.f32.mrb[18].mxu0 }
 0x61d   : > { %v3551_v43 = vpop.f32.mrb[19].mxu0  ;;  %v1556_v44 = vsel %vm4746_vm3, %v1555_v40, -1e+30 }
 0x61e   : > { %v1557_v48 = vsel %vm978_vm4, %v1556_v44, -inf }
 0x61f   : > { %1558 = vmax.xlane.f32.xlu0 %v1557_v48 }
 0x622   : > { %v1662_v49 = vpop.f32.mrb[20].mxu0 }
 0x623   : > { %v1668_v50 = vmul.f32 0.17677669, %v1662_v49  ;;  %v3562_v52 = vpop.f32.mrb[21].mxu0 }
 0x624   : > { %v1665_v53 = vpop.f32.mrb[22].mxu0 }
 0x625   : > { %v3563_v54 = vpop.f32.mrb[23].mxu0  ;;  %v1669_v55 = vsel %vm4746_vm3, %v1668_v50, -1e+30 }
 0x626   : > { %v1670_v56 = vsel %vm978_vm4, %v1669_v55, -inf }
 0x627   : > { %1671 = vmax.xlane.f32.xlu1 %v1670_v56 }
 0x62a   : > { %v1774_v57 = vpop.f32.mrb[24].mxu0 }
 0x62b   : > { %v1780_v58 = vmul.f32 0.17677669, %v1774_v57  ;;  %v3574_v59 = vpop.f32.mrb[25].mxu0 }
 0x62c   : > { %v1777_v60 = vpop.f32.mrb[26].mxu0 }
 0x62d   : > { %v3575_v62 = vpop.f32.mrb[27].mxu0  ;;  %v1781_v63 = vsel %vm4746_vm3, %v1780_v58, -1e+30 }
 0x62e   : > { %v1782_v0 = vsel %vm978_vm4, %v1781_v63, -inf }
 0x62f   : > { %1783 = vmax.xlane.f32.xlu0 %v1782_v0 }
 0x694   : > { %v1207_v1 = vpop.xlane.xlu1 %1206 }
 0x695   : > { %v1208_v3 = vsub.f32 %v1204_v13, %v1207_v1 }
 0x697   : > { %v1209_v4 = vmul.f32 1.442695, %v1208_v3 }
 0x699   : > { %3869 = vpow2.f32 %v1209_v4 }
 0x69b   : > { %v1094_v5 = vpop.xlane.xlu0 %1093 }
 0x69c   : > { %v1095_v7 = vsub.f32 %v1091_v26, %v1094_v5 }
 0x69e   : > { %v1096_v11 = vmul.f32 1.442695, %v1095_v7 }
 0x69f   : > { %v1319_v8 = vpop.xlane.xlu0 %1318 }
 0x6a0   : > { %v1320_v9 = vsub.f32 %v1316_v29, %v1319_v8 }
 0x6a2   : > { %v1321_v12 = vmul.f32 1.442695, %v1320_v9 }
 0x6a3   : > { %v4827_v14 = vpop.eup %3869 }
 0x6a4   : > { %3871 = vpow2.f32 %v1321_v12  ;;  %v1447_v15 = vpop.xlane.xlu0 %1446  ;;  %v1211_v23 = vsel %vm978_vm4, %v4827_v14, 0.0 }
 0x6a5   : > { %v1448_v16 = vsub.f32 %v1444_v37, %v1447_v15  ;;  %1212 = vadd.xlane.f32.xlu0 %v1211_v23  ;;  %3873 = vpow2.f32 %v1096_v11 }
 0x6a7   : > { %v1449_v17 = vmul.f32 1.442695, %v1448_v16 }
 0x6a9   : > { %3875 = vpow2.f32 %v1449_v17 }
 0x6ac   : > { %v1559_v13 = vpop.xlane.xlu0 %1558 }
 0x6ad   : > { %v1560_v19 = vsub.f32 %v1556_v44, %v1559_v13 }
 0x6ae   : > { %v4831_v20 = vpop.eup %3871 }
 0x6af   : > { %v1561_v21 = vmul.f32 1.442695, %v1560_v19  ;;  %v1323_v22 = vsel %vm978_vm4, %v4831_v20, 0.0  ;;  %v3874_v24 = vpop.eup %3873 }
 0x6b0   : > { %1324 = vadd.xlane.f32.xlu1 %v1323_v22  ;;  %v1098_v26 = vsel %vm978_vm4, %v3874_v24, 0.0 }
 0x6b1   : > { %3877 = vpow2.f32 %v1561_v21 }
 0x6b3   : > { %v4835_v25 = vpop.eup %3875 }
 0x6b4   : > { %1099 = vadd.xlane.f32.xlu1 %v1098_v26  ;;  %v1451_v27 = vsel %vm978_vm4, %v4835_v25, 0.0  ;;  %v1672_v30 = vpop.xlane.xlu1 %1671  ;;  %v3773_v26 = vld [vmem:[%s4633_s10] sm:$0xff]  }
 0x6b5   : > { %1452 = vadd.xlane.f32.xlu0 %v1451_v27  ;;  %v1673_v31 = vsub.f32 %v1669_v55, %v1672_v30  ;;  %3583 = vmatpush3.bf16.msra.mxu0 %v3773_v26  ;;  %v3774_v27 = vld [vmem:[%s4633_s10 + $0x8] sm:$0xff]  }
 0x6b6   : > { %3584 = vmatprep.subr.bf16.mxu0 %v4247_v6 }
 0x6b7   : > { %v1674_v33 = vmul.f32 1.442695, %v1673_v31 }
 0x6b9   : > { %3879 = vpow2.f32 %v1674_v33  ;;  %3585 = vmatpush3.bf16.msra.mxu0 %v3774_v27 }
 0x6ba   : > { %3586 = vmatprep.subr.bf16.mxu0 %v4247_v6 }
 0x6bb   : > { %v4840_v28 = vpop.eup %3877 }
 0x6bc   : > { %v1563_v29 = vsel %vm978_vm4, %v4840_v28, 0.0  ;;  %v1784_v34 = vpop.xlane.xlu0 %1783 }
 0x6bd   : > { %1564 = vadd.xlane.f32.xlu0 %v1563_v29  ;;  %v1785_v35 = vsub.f32 %v1781_v63, %v1784_v34 }
 0x6bf   : > { %v1786_v36 = vmul.f32 1.442695, %v1785_v35 }
 0x6c1   : > { %3881 = vpow2.f32 %v1786_v36 }
 0x6c3   : > { %v4850_v37 = vpop.eup %3879 }
 0x6c4   : > { %v1676_v38 = vsel %vm978_vm4, %v4850_v37, 0.0 }
 0x6c5   : > { %1105 = vrot.lane.b32.xlu1 %v4737_v18, %s4250_s11 }
 0x6cb   : > { %v4854_v39 = vpop.eup %3881 }
 0x6cc   : > { %v1788_v40 = vsel %vm978_vm4, %v4854_v39, 0.0 }
 0x6d3   : > { %1217 = vrot.lane.b32.xlu0 %v4737_v18, %s4252_s23 }
 0x6d7   : > { %1329 = vrot.lane.b32.xlu0 %v4737_v18, %s4251_s21  ;;  %v1395_v18 = vpack.c.bf16 %v4733_v10, %v4733_v10 }
 0x6d9   : > { %v1461_v3 = vsel %vm994_vm2, %v1395_v18, 0 }
 0x6e9   : > { %1677 = vadd.xlane.f32.xlu1 %v1676_v38 }
 0x6f6   : > { %1789 = vadd.xlane.f32.xlu0 %v1788_v40 }
 0x6fa   : > { %1570 = vrot.lane.b32.xlu1 %v1395_v18, %s4250_s11 }
 0x6fe   : > { %1794 = vrot.lane.b32.xlu1 %v1395_v18, %s4251_s21 }
 0x70c   : > { %1682 = vrot.lane.b32.xlu0 %v1395_v18, %s4252_s23 }
 0x732   : > { %v1213_v43 = vpop.xlane.xlu0 %1212 }
 0x73d   : > { %v1325_v41 = vpop.xlane.xlu1 %1324 }
 0x741   : > { %v1100_v42 = vpop.xlane.xlu1 %1099 }
 0x742   : > { %3883 = vrcp.f32 %v1100_v42  ;;  %v1453_v48 = vpop.xlane.xlu0 %1452 }
 0x743   : > { %3885 = vrcp.f32 %v1213_v43 }
 0x744   : > { %3887 = vrcp.f32 %v1325_v41 }
 0x745   : > { %v1106_v44 = vpop.permute.xlu1 %1105  ;;  %3889 = vrcp.f32 %v1453_v48  ;;  %v3776_v48 = vld [vmem:[%s4633_s10 + $0x18] sm:$0xff]  }
 0x746   : > { %v1111_v49 = vsel %vm994_vm2, %v1106_v44, 0  ;;  %v3775_v44 = vld [vmem:[%s4633_s10 + $0x10] sm:$0xff]  }
 0x747   : > { %3505 = vmatpush3.bf16.msra.mxu1 %v1111_v49  ;;  %3587 = vmatpush3.bf16.msra.mxu0 %v3775_v44  ;;  %v3777_v49 = vld [vmem:[%s4633_s10 + $0x20] sm:$0xff]  }
 0x748   : > { %3516 = vmatprep.subr.bf16.mxu1 %v4247_v6  ;;  %3588 = vmatprep.subr.bf16.mxu0 %v4247_v6 }
 0x74a   : > { %v1565_v50 = vpop.xlane.xlu0 %1564 }
 0x74b   : > { %3891 = vrcp.f32 %v1565_v50  ;;  %3589 = vmatpush3.bf16.msra.mxu0 %v3776_v48 }
 0x74c   : > { %v3884_v10 = vpop.eup %3883  ;;  %3590 = vmatprep.subr.bf16.mxu0 %v4247_v6 }
 0x74d   : > { %v1102_v52 = vmul.f32 %v3884_v10, %v3874_v24  ;;  %v3886_v56 = vpop.eup %3885 }
 0x74e   : > { %v1218_v53 = vpop.permute.xlu0 %1217  ;;  %v1215_v57 = vmul.f32 %v3886_v56, %v4827_v14  ;;  %v3888_v60 = vpop.eup %3887  ;;  %v3779_v56 = vld [vmem:[%s4633_s10 + $0x30] sm:$0xff]  }
 0x74f   : > { %v1223_v54 = vsel %vm994_vm2, %v1218_v53, 0  ;;  %v1103_v55 = vpack.c.bf16 %v1102_v52, %v1102_v52  ;;  %v1327_v63 = vmul.f32 %v3888_v60, %v4831_v20  ;;  %v3890_v1 = vpop.eup %3889  ;;  %3591 = vmatpush3.bf16.msra.mxu0 %v3777_v49 }
 0x750   : > { %v1216_v59 = vpack.c.bf16 %v1215_v57, %v1215_v57  ;;  %v1455_v4 = vmul.f32 %v3890_v1, %v4835_v25  ;;  %3592 = vmatprep.subr.bf16.mxu0 %v4247_v6  ;;  %v3780_v57 = vld [vmem:[%s4633_s10 + $0x38] sm:$0xff]  }
 0x751   : > { %3507 = vmatmul.mubr.msk.bf16.vlgmr.msra.gmra.mrb[16].mxu1 %vm978_vm4, %v1103_v55  ;;  %v1328_v0 = vpack.c.bf16 %v1327_v63, %v1327_v63  ;;  %v3778_v55 = vld [vmem:[%s4633_s10 + $0x28] sm:$0xff]  }
 0x752   : > { %3517 = vmatpush3.bf16.msra.mxu1 %v1223_v54  ;;  %3518 = vmatprep.mubr.msk.bf16.mxu1 %vm4249_vm0, %v4247_v6  ;;  %v1330_v58 = vpop.permute.xlu0 %1329  ;;  %v1456_v5 = vpack.c.bf16 %v1455_v4, %v1455_v4 }
 0x753   : > { %3528 = vmatprep.subr.bf16.mxu1 %v4247_v6  ;;  %v1335_v62 = vsel %vm994_vm2, %v1330_v58, 0  ;;  %3593 = vmatpush3.bf16.msra.mxu0 %v3778_v55  ;;  %v3793_v55 = vld [vmem:[%s4635_s1 + $0x40] ss:$16 sps:$4 sm:$0xff]  }
 0x754   : > { %3594 = vmatprep.subr.bf16.mxu0 %v4247_v6 }
 0x755   : > { %v3892_v7 = vpop.eup %3891 }
 0x756   : > { %v1567_v9 = vmul.f32 %v3892_v7, %v4840_v28 }
 0x757   : > { %3595 = vmatpush3.bf16.msra.mxu0 %v3779_v56  ;;  %v3796_v56 = vld [vmem:[%s4635_s1 + $0x48] ss:$16 sps:$4 sm:$0xff]  }
 0x758   : > { %v1568_v14 = vpack.c.bf16 %v1567_v9, %v1567_v9  ;;  %3596 = vmatprep.subr.bf16.mxu0 %v4247_v6 }
 0x759   : > { %3519 = vmatmul.mubr.msk.bf16.vlgmr.msra.gmra.mrb[20].mxu1 %vm978_vm4, %v1216_v59 }
 0x75a   : > { %3529 = vmatpush3.bf16.msra.mxu1 %v1335_v62  ;;  %3530 = vmatprep.mubr.msk.bf16.mxu1 %vm4249_vm0, %v4247_v6 }
 0x75b   : > { %3540 = vmatprep.subr.bf16.mxu1 %v4247_v6  ;;  %3597 = vmatpush3.bf16.msra.mxu0 %v3780_v57  ;;  %v3801_v57 = vld [vmem:[%s4635_s1 + $0x64] ss:$16 sps:$4 sm:$0xff]  }
 0x761   : > { %3531 = vmatmul.mubr.msk.bf16.vlgmr.msra.gmra.mrb[24].mxu1 %vm978_vm4, %v1328_v0 }
 0x762   : > { %3541 = vmatpush3.bf16.msra.mxu1 %v1461_v3  ;;  %3542 = vmatprep.mubr.msk.bf16.mxu1 %vm4249_vm0, %v4247_v6 }
 0x763   : > { %3552 = vmatprep.subr.bf16.mxu1 %v4247_v6 }
 0x769   : > { %3543 = vmatmul.mubr.msk.bf16.vlgmr.msra.gmra.mrb[28].mxu1 %vm978_vm4, %v1456_v5 }
 0x76a   : > { %3554 = vmatprep.mubr.msk.bf16.mxu1 %vm4249_vm0, %v4247_v6 }
 0x776   : > { %v1678_v8 = vpop.xlane.xlu1 %1677 }
 0x777   : > { %3893 = vrcp.f32 %v1678_v8 }
 0x77a   : > { %v1571_v11 = vpop.permute.xlu1 %1570 }
 0x77b   : > { %v1576_v12 = vsel %vm994_vm2, %v1571_v11, 0 }
 0x77c   : > { %3553 = vmatpush3.bf16.msra.mxu1 %v1576_v12 }
 0x77d   : > { %3564 = vmatprep.subr.bf16.mxu1 %v4247_v6 }
 0x77e   : > { %v1795_v19 = vpop.permute.xlu1 %1794 }
 0x77f   : > { %3555 = vmatmul.mubr.msk.bf16.vlgmr.msra.gmra.mrb[32].mxu1 %vm978_vm4, %v1568_v14  ;;  %v1800_v21 = vsel %vm994_vm2, %v1795_v19, 0 }
 0x780   : > { %3566 = vmatprep.mubr.msk.bf16.mxu1 %vm4249_vm0, %v4247_v6 }
 0x781   : > { %v3894_v15 = vpop.eup %3893 }
 0x782   : > { %v1680_v16 = vmul.f32 %v3894_v15, %v4850_v37 }
 0x783   : > { %v1790_v23 = vpop.xlane.xlu0 %1789 }
 0x784   : > { %3895 = vrcp.f32 %v1790_v23  ;;  %v1681_v20 = vpack.c.bf16 %v1680_v16, %v1680_v16 }
 0x787   : > { %v1683_v17 = vpop.permute.xlu0 %1682 }
 0x788   : > { %v1688_v13 = vsel %vm994_vm2, %v1683_v17, 0 }
 0x789   : > { %3565 = vmatpush3.bf16.msra.mxu1 %v1688_v13 }
 0x78a   : > { %3576 = vmatprep.subr.bf16.mxu1 %v4247_v6 }
 0x78c   : > { %3567 = vmatmul.mubr.msk.bf16.vlgmr.msra.gmra.mrb[36].mxu1 %vm978_vm4, %v1681_v20 }
 0x78d   : > { %3577 = vmatpush3.bf16.msra.mxu1 %v1800_v21  ;;  %3578 = vmatprep.mubr.msk.bf16.mxu1 %vm4249_vm0, %v4247_v6  ;;  %vm2883_vm0 = vcmask (!%p3345_p13), 1041408  }
 0x78e   : > { %v3896_v22 = vpop.eup %3895 }
 0x78f   : > { %v1792_v24 = vmul.f32 %v3896_v22, %v4854_v39 }
 0x791   : > { %v1793_v25 = vpack.c.bf16 %v1792_v24, %v1792_v24  ;;  %v1876_v24 = vsub.s32 4, %v4705_v45 }
 0x794   : > { %3579 = vmatmul.mubr.msk.bf16.vlgmr.msra.gmra.mrb[40].mxu1 %vm978_vm4, %v1793_v25  ;;  %v1877_v25 = vrot.slane %v4711_v47, %v1876_v24  ;;  %v1994_v24 = vrot.slane %v4711_v47, %v4728_v61 }
 0x795   : > { %2250 = vmatprep.mubr.bf16.mxu1 %v4248_v32 }
 0x824   : > { %v1147_v28 = vpop.f32.mrb[16].mxu1 }
 0x825   : > { %v3508_v29 = vpop.f32.mrb[17].mxu1 }
 0x826   : > { %v1150_v30 = vpop.f32.mrb[18].mxu1  ;;  %v3933_v29 = vld [vmem:[#allocation2] sm:$0xff] }
 0x827   : > { %v3509_v31 = vpop.f32.mrb[19].mxu1 }
 0x82c   : > { %v1259_v33 = vpop.f32.mrb[20].mxu1 }
 0x82d   : > { %v3520_v34 = vpop.f32.mrb[21].mxu1 }
 0x82e   : > { %v1262_v35 = vpop.f32.mrb[22].mxu1 }
 0x82f   : > { %v3521_v36 = vpop.f32.mrb[23].mxu1  ;;  %v3781_v35 = vld [vmem:[%s4635_s1] ss:$16 sps:$4 sm:$0xff]  }
 0x830   : > { %v3783_v36 = vld [vmem:[%s4635_s1 + $0x4] ss:$16 sps:$4 sm:$0xff]  }
 0x831   : > { %2218 = vmatprep.subr.bf16.mxu1 %v3783_v36  ;;  %v3829_v36 = vld [vmem:[%s4641_s24 + $0x40] sm:$0xff]  }
 0x832   : > { %2219 = vmatpush1.bf16.msra.mxu1 %v3781_v35 }
 0x834   : > { %v1371_v37 = vpop.f32.mrb[24].mxu1 }
 0x835   : > { %v3532_v38 = vpop.f32.mrb[25].mxu1 }
 0x836   : > { %v1374_v39 = vpop.f32.mrb[26].mxu1  ;;  %v3786_v38 = vld [vmem:[%s4635_s1 + $0xc] ss:$16 sps:$4 sm:$0xff]  }
 0x837   : > { %v3533_v40 = vpop.f32.mrb[27].mxu1  ;;  %v3789_v39 = vld [vmem:[%s4635_s1 + $0x24] ss:$16 sps:$4 sm:$0xff]   ;;  %2261 = vmatprep.subr.bf16.mxu0 %v3786_v38 }
 0x838   : > { %v3792_v40 = vld [vmem:[%s4635_s1 + $0x2c] ss:$16 sps:$4 sm:$0xff]   ;;  %2220 = vmatprep.subr.bf16.mxu1 %v3789_v39  ;;  %v3831_v38 = vld [vmem:[%s4641_s24] sm:$0xff]  }
 0x839   : > { %v3832_v39 = vld [vmem:[%s4641_s24 + $0x80] sm:$0xff]  }
 0x83c   : > { %v1497_v18 = vpop.f32.mrb[28].mxu1 }
 0x83d   : > { %v3544_v41 = vpop.f32.mrb[29].mxu1 }
 0x83e   : > { %v1500_v42 = vpop.f32.mrb[30].mxu1  ;;  %v3790_v41 = vld [vmem:[%s4635_s1 + $0x28] ss:$16 sps:$4 sm:$0xff]  }
 0x83f   : > { %v3545_v43 = vpop.f32.mrb[31].mxu1 }
 0x852   : > { %v1612_v50 = vpop.f32.mrb[32].mxu1 }
 0x853   : > { %v3726_v10 = vpack.i.bf16 %v1612_v50, %v1147_v28  ;;  %v3556_v52 = vpop.f32.mrb[33].mxu1 }
 0x854   : > { %v1615_v53 = vpop.f32.mrb[34].mxu1 }
 0x855   : > { %3727 = vrot.lane.b32.xlu1 %v3726_v10, %s4251_s21  ;;  %v3557_v54 = vpop.f32.mrb[35].mxu1  ;;  %v3795_v53 = vld [vmem:[%s4635_s1 + $0x44] ss:$16 sps:$4 sm:$0xff]   ;;  %s5281_s21 = sld [smem:[#allocation28_spill]] (!%p3345_p13) }
 0x856   : > { %v3798_v54 = vld [vmem:[%s4635_s1 + $0x4c] ss:$16 sps:$4 sm:$0xff]  }
 0x85f   : > { %v1724_v58 = vpop.f32.mrb[36].mxu1 }
 0x860   : > { %v3731_v59 = vpack.i.bf16 %v1724_v58, %v1259_v33  ;;  %v3568_v60 = vpop.f32.mrb[37].mxu1  ;;  %v3804_v58 = vld [vmem:[%s4635_s1 + $0x6c] ss:$16 sps:$4 sm:$0xff]  }
 0x861   : > { %v1727_v62 = vpop.f32.mrb[38].mxu1  ;;  %v3802_v60 = vld [vmem:[%s4635_s1 + $0x68] ss:$16 sps:$4 sm:$0xff]  }
 0x862   : > { %3732 = vrot.lane.b32.xlu1 %v3731_v59, %s4252_s23  ;;  %v3569_v63 = vpop.f32.mrb[39].mxu1  ;;  %v3799_v59 = vld [vmem:[%s4635_s1 + $0x60] ss:$16 sps:$4 sm:$0xff]   ;;  %v3807_v62 = vld [vmem:[%s4635_s1 + $0x84] ss:$16 sps:$4 sm:$0xff]  }
 0x863   : > { %v3810_v63 = vld [vmem:[%s4635_s1 + $0x8c] ss:$16 sps:$4 sm:$0xff]  }
 0x867   : > { %v1836_v0 = vpop.f32.mrb[40].mxu1 }
 0x868   : > { %v3736_v1 = vpack.i.bf16 %v1836_v0, %v1371_v37  ;;  %v3580_v3 = vpop.f32.mrb[41].mxu1  ;;  %v3784_v37 = vld [vmem:[%s4635_s1 + $0x8] ss:$16 sps:$4 sm:$0xff]   ;;  %v3805_v0 = vld [vmem:[%s4635_s1 + $0x80] ss:$16 sps:$4 sm:$0xff]  }
 0x869   : > { %v1839_v4 = vpop.f32.mrb[42].mxu1  ;;  %v3813_v3 = vld [vmem:[%s4635_s1 + $0xa4] ss:$16 sps:$4 sm:$0xff]  }
 0x86a   : > { %3737 = vrot.lane.b32.xlu1 %v3736_v1, %s4250_s11  ;;  %v3581_v5 = vpop.f32.mrb[43].mxu1  ;;  %v3808_v1 = vld [vmem:[%s4635_s1 + $0x88] ss:$16 sps:$4 sm:$0xff]   ;;  %v3816_v4 = vld [vmem:[%s4635_s1 + $0xac] ss:$16 sps:$4 sm:$0xff]  }
 0x86b   : > { %v3811_v5 = vld [vmem:[%s4635_s1 + $0xa0] ss:$16 sps:$4 sm:$0xff]  }
 0x8c7   : > { %v3728_v7 = vpop.permute.xlu1 %3727 }
 0x8c8   : > { %v3730_v9 = vunpack.i.h.bf16 %v3728_v7  ;;  %v3729_v6 = vunpack.i.l.bf16 %v3728_v7  ;;  %v3814_v7 = vld [vmem:[%s4635_s1 + $0xa8] ss:$16 sps:$4 sm:$0xff]  }
 0x8ca   : > { %v1854_v15 = vsel %vm929_vm1, %v1497_v18, %v3730_v9  ;;  %v1389_v23 = vsel %vm929_vm1, %v4804_v2, %v3729_v6  ;;  %v3787_v18 = vld [vmem:[%s4635_s1 + $0x20] ss:$16 sps:$4 sm:$0xff]   ;;  %v3822_v9 = vld [vmem:[%s4635_s1 + $0xcc] ss:$16 sps:$4 sm:$0xff]   ;;  %vm4254_vm1 = vmmov (!%p3345_p13), 0  }
 0x8cb   : > { %2221 = vmatpush1.bf16.msra.mxu1 %v3787_v18  ;;  %v3817_v6 = vld [vmem:[%s4635_s1 + $0xc0] ss:$16 sps:$4 sm:$0xff]   ;;  %v3835_v18 = vld [vmem:[%s4641_s24 + $0x8] sm:$0xff]  }
 0x8cc   : > { %2222 = vmatprep.subr.bf16.mxu1 %v3795_v53  ;;  %v3845_v53 = vld [vmem:[%s4641_s24 + $0x60] sm:$0xff]  }
 0x8cf   : > { %2223 = vmatpush1.bf16.msra.mxu1 %v3793_v55  ;;  %v3847_v55 = vld [vmem:[%s4641_s24 + $0x20] sm:$0xff]  }
 0x8d0   : > { %2224 = vmatprep.subr.bf16.mxu1 %v3801_v57  ;;  %v3849_v57 = vld [vmem:[%s4641_s24 + $0x68] sm:$0xff]  }
 0x8d3   : > { %2225 = vmatpush1.bf16.msra.mxu1 %v3799_v59  ;;  %v3851_v59 = vld [vmem:[%s4641_s24 + $0x28] sm:$0xff]  }
 0x8d4   : > { %v3733_v8 = vpop.permute.xlu1 %3732  ;;  %2226 = vmatprep.subr.bf16.mxu1 %v3807_v62  ;;  %v3853_v62 = vld [vmem:[%s4641_s24 + $0x70] sm:$0xff]  }
 0x8d5   : > { %v3735_v11 = vunpack.i.h.bf16 %v3733_v8  ;;  %v3734_v12 = vunpack.i.l.bf16 %v3733_v8  ;;  %v3819_v8 = vld [vmem:[%s4635_s1 + $0xc4] ss:$16 sps:$4 sm:$0xff]  }
 0x8d7   : > { %v1855_v13 = vsel %vm1390_vm5, %v1854_v15, %v3735_v11  ;;  %v1391_v19 = vsel %vm1390_vm5, %v1389_v23, %v3734_v12  ;;  %2227 = vmatpush1.bf16.msra.mxu1 %v3805_v0  ;;  %v3820_v11 = vld [vmem:[%s4635_s1 + $0xc8] ss:$16 sps:$4 sm:$0xff]   ;;  %v3825_v12 = vld [vmem:[%s4635_s1 + $0xe4] ss:$16 sps:$4 sm:$0xff]   ;;  %v3823_v15 = vld [vmem:[%s4635_s1 + $0xe0] ss:$16 sps:$4 sm:$0xff]  }
 0x8d8   : > { %2228 = vmatprep.subr.bf16.mxu1 %v3813_v3  ;;  %v3826_v23 = vld [vmem:[%s4635_s1 + $0xe8] ss:$16 sps:$4 sm:$0xff]   ;;  %v3855_v0 = vld [vmem:[%s4641_s24 + $0x30] sm:$0xff]  }
 0x8d9   : > { %v3857_v3 = vld [vmem:[%s4641_s24 + $0x78] sm:$0xff]  }
 0x8db   : > { %2229 = vmatpush1.bf16.msra.mxu1 %v3811_v5  ;;  %v3859_v5 = vld [vmem:[%s4641_s24 + $0x38] sm:$0xff]  }
 0x8dc   : > { %v3738_v14 = vpop.permute.xlu1 %3737  ;;  %2230 = vmatprep.subr.bf16.mxu1 %v3819_v8  ;;  %v2036_v8 = vld [vmem:[%s4656_s6] sm:$0xf] }
 0x8dd   : > { %v3740_v16 = vunpack.i.h.bf16 %v3738_v14  ;;  %v3739_v17 = vunpack.i.l.bf16 %v3738_v14  ;;  %v3828_v14 = vld [vmem:[%s4635_s1 + $0xec] ss:$16 sps:$4 sm:$0xff]  }
 0x8df   : > { %v1856_v20 = vsel %vm1392_vm6, %v1855_v13, %v3740_v16  ;;  %v1393_v21 = vsel %vm1392_vm6, %v1391_v19, %v3739_v17  ;;  %2231 = vmatpush1.bf16.msra.mxu1 %v3817_v6  ;;  %v2049_v6 = vrot.slane %v2036_v8, %v4728_v61 }
 0x8e0   : > { %v1857_v22 = vpack.c.bf16 %v1856_v20, %v1393_v21  ;;  %2232 = vmatprep.subr.bf16.mxu1 %v3825_v12 }
 0x8e2   : > { %3599 = vmatmul.mubr.bf16.vlgmr.msra.gmra.mrb[28].mxu0 %v1857_v22 }
 0x8e3   : > { %2293 = vmatprep.mubr.bf16.mxu0 %v4248_v32  ;;  %v3934_v32 = vld [vmem:[#allocation2 + $0x8] sm:$0xff]  ;;  %2262 = vmatpush1.bf16.msra.mxu0 %v3784_v37  ;;  %v3830_v37 = vld [vmem:[%s4641_s24 + $0xc0] sm:$0xff]  }
 0x8e4   : > { %2263 = vmatprep.subr.bf16.mxu0 %v3792_v40  ;;  %2233 = vmatpush1.bf16.msra.mxu1 %v3823_v15  ;;  %v3834_v40 = vld [vmem:[%s4641_s24 + $0xc8] sm:$0xff]  }
 0x8e5   : > { %3413 = vmatprep.subr.bf16.mxu1 %v3829_v36 }
 0x8e7   : > { %2264 = vmatpush1.bf16.msra.mxu0 %v3790_v41  ;;  %v3836_v41 = vld [vmem:[%s4641_s24 + $0x88] sm:$0xff]  }
 0x8e8   : > { %2265 = vmatprep.subr.bf16.mxu0 %v3798_v54  ;;  %v3846_v54 = vld [vmem:[%s4641_s24 + $0xe0] sm:$0xff]  }
 0x8eb   : > { %2266 = vmatpush1.bf16.msra.mxu0 %v3796_v56  ;;  %v3848_v56 = vld [vmem:[%s4641_s24 + $0xa0] sm:$0xff]  }
 0x8ec   : > { %2267 = vmatprep.subr.bf16.mxu0 %v3804_v58  ;;  %v3850_v58 = vld [vmem:[%s4641_s24 + $0xe8] sm:$0xff]  }
 0x8ef   : > { %2268 = vmatpush1.bf16.msra.mxu0 %v3802_v60  ;;  %v3852_v60 = vld [vmem:[%s4641_s24 + $0xa8] sm:$0xff]  }
 0x8f0   : > { %2269 = vmatprep.subr.bf16.mxu0 %v3810_v63  ;;  %v3854_v63 = vld [vmem:[%s4641_s24 + $0xf0] sm:$0xff]  }
 0x8f3   : > { %2270 = vmatpush1.bf16.msra.mxu0 %v3808_v1  ;;  %v3856_v1 = vld [vmem:[%s4641_s24 + $0xb0] sm:$0xff]  }
 0x8f4   : > { %2271 = vmatprep.subr.bf16.mxu0 %v3816_v4  ;;  %v3858_v4 = vld [vmem:[%s4641_s24 + $0xf8] sm:$0xff]  }
 0x8f7   : > { %2272 = vmatpush1.bf16.msra.mxu0 %v3814_v7  ;;  %v3860_v7 = vld [vmem:[%s4641_s24 + $0xb8] sm:$0xff]  }
 0x8f8   : > { %2273 = vmatprep.subr.bf16.mxu0 %v3822_v9  ;;  %v2041_v9 = vrot.slane %v2036_v8, %v4708_v46 }
 0x8fb   : > { %2274 = vmatpush1.bf16.msra.mxu0 %v3820_v11  ;;  %v2045_v11 = vrot.slane %v2036_v8, %v4717_v51 }
 0x8fc   : > { %2275 = vmatprep.subr.bf16.mxu0 %v3828_v14 }
 0x8ff   : > { %2276 = vmatpush1.bf16.msra.mxu0 %v3826_v23 }
 0x900   : > { %3435 = vmatprep.subr.bf16.mxu0 %v3830_v37 }
 0x9b5   : > { %v1960_v26 = vpop.f32.mrb[28].mxu0 }
 0x9b6   : > { %v1961_v2 = vadd.f32 %v1960_v26, %v1877_v25  ;;  %v3600_v27 = vpop.f32.mrb[29].mxu0  ;;  %v1999_v26 = vsub.s32 3, %v4705_v45 }
 0x9b7   : > { %v1963_v28 = vpop.f32.mrb[30].mxu0 }
 0x9b8   : > { %v4926_v30 = vadd.f32 %v3933_v29, %v1961_v2  ;;  %v1964_v31 = vadd.f32 %v1963_v28, %v1877_v25  ;;  %v3601_v33 = vpop.f32.mrb[31].mxu0  ;;  %v2000_v29 = vrot.slane %v4711_v47, %v1999_v26  ;;  %v3833_v47 = vld [vmem:[%s4641_s24 + $0x48] sm:$0xff]   ;;  %v2053_v12 = vrot.slane %v2036_v8, %v1999_v26 }
 0x9ba   : > { %v4928_v34 = vadd.f32 %v3934_v32, %v1964_v31  ;;  %1969 = vadd.xlane.f32.xlu1 %v4926_v30 }
 0x9bc   : > { %1971 = vadd.xlane.f32.xlu0 %v4928_v34 }
 0xa47   : > { %v1970_v42 = vpop.xlane.xlu1 %1969 }
 0xa48   : > { %v1973_v43 = vmul.f32 0.0078125, %v1970_v42  ;;  %v3837_v42 = vld [vmem:[%s4641_s24 + $0x50] sm:$0xff]  }
 0xa49   : > { %v1972_v44 = vpop.xlane.xlu0 %1971 }
 0xa4a   : > { %v4941_v48 = vsub.f32 %v4926_v30, %v1973_v43  ;;  %v1974_v49 = vmul.f32 0.0078125, %v1972_v44  ;;  %v3838_v43 = vld [vmem:[%s4641_s24 + $0xd0] sm:$0xff]  }
 0xa4b   : > { %v3839_v44 = vld [vmem:[%s4641_s24 + $0x10] sm:$0xff]  }
 0xa4c   : > { %v4944_v50 = vsub.f32 %v4928_v34, %v1974_v49  ;;  %v1977_v10 = vmul.f32 %v4941_v48, %v4941_v48  ;;  %v3841_v49 = vld [vmem:[%s4641_s24 + $0x58] sm:$0xff]  }
 0xa4e   : > { %1979 = vadd.xlane.f32.xlu0 %v1977_v10  ;;  %v1978_v52 = vmul.f32 %v4944_v50, %v4944_v50  ;;  %v3843_v10 = vld [vmem:[%s4641_s24 + $0x18] sm:$0xff]  }
 0xa52   : > { %1981 = vadd.xlane.f32.xlu0 %v1978_v52  ;;  %v3844_v52 = vld [vmem:[%s4641_s24 + $0x98] sm:$0xff]  }
 0xadb   : > { %v1980_v16 = vpop.xlane.xlu0 %1979 }
 0xadc   : > { %v1983_v17 = vmul.f32 0.0078125, %v1980_v16 }
 0xade   : > { %v1985_v13 = vadd.f32 1e-05, %v1983_v17 }
 0xadf   : > { %v1982_v19 = vpop.xlane.xlu0 %1981 }
 0xae0   : > { %3897 = vrsqrt.f32 %v1985_v13  ;;  %v1984_v20 = vmul.f32 0.0078125, %v1982_v19 }
 0xae2   : > { %v1986_v21 = vadd.f32 1e-05, %v1984_v20 }
 0xae4   : > { %3899 = vrsqrt.f32 %v1986_v21 }
 0xaea   : > { %v3898_v22 = vpop.eup %3897 }
 0xaeb   : > { %v1989_v25 = vmul.f32 %v3898_v22, %v4941_v48  ;;  %v3840_v48 = vld [vmem:[%s4641_s24 + $0x90] sm:$0xff]  }
 0xaed   : > { %v1995_v28 = vmul.f32 %v1994_v24, %v1989_v25 }
 0xaee   : > { %v3900_v2 = vpop.eup %3899 }
 0xaef   : > { %v1990_v27 = vmul.f32 %v3900_v2, %v4944_v50  ;;  %v2001_v33 = vadd.f32 %v2000_v29, %v1995_v28  ;;  %v3842_v50 = vld [vmem:[%s4641_s24 + $0xd8] sm:$0xff]  }
 0xaf1   : > { %v1996_v31 = vmul.f32 %v1994_v24, %v1990_v27 }
 0xaf3   : > { %v2002_v32 = vadd.f32 %v2000_v29, %v1996_v31 }
 0xaf5   : > { %v2003_v35 = vpack.c.bf16 %v2002_v32, %v2001_v33 }
 0xaf7   : > { %2251 = vmatmul.mubr.bf16.vlgmr.msra.gmra.mrb[44].mxu1 %v2003_v35  ;;  %2294 = vmatmul.mubr.bf16.vlgmr.msra.gmra.mrb[32].mxu0 %v2003_v35 }
 0xaf8   : > { %3414 = vmatpush3.bf16.msra.mxu1 %v3831_v38  ;;  %3436 = vmatpush3.bf16.msra.mxu0 %v3832_v39 }
 0xaf9   : > { %3415 = vmatprep.subr.bf16.mxu1 %v3833_v47  ;;  %3437 = vmatprep.subr.bf16.mxu0 %v3834_v40 }
 0xafc   : > { %3416 = vmatpush3.bf16.msra.mxu1 %v3835_v18  ;;  %3438 = vmatpush3.bf16.msra.mxu0 %v3836_v41 }
 0xafd   : > { %3417 = vmatprep.subr.bf16.mxu1 %v3837_v42  ;;  %3439 = vmatprep.subr.bf16.mxu0 %v3838_v43 }
 0xb00   : > { %3418 = vmatpush3.bf16.msra.mxu1 %v3839_v44  ;;  %3440 = vmatpush3.bf16.msra.mxu0 %v3840_v48 }
 0xb01   : > { %3419 = vmatprep.subr.bf16.mxu1 %v3841_v49  ;;  %3441 = vmatprep.subr.bf16.mxu0 %v3842_v50 }
 0xb04   : > { %3420 = vmatpush3.bf16.msra.mxu1 %v3843_v10  ;;  %3442 = vmatpush3.bf16.msra.mxu0 %v3844_v52 }
 0xb05   : > { %3421 = vmatprep.subr.bf16.mxu1 %v3845_v53  ;;  %3443 = vmatprep.subr.bf16.mxu0 %v3846_v54 }
 0xb08   : > { %3422 = vmatpush3.bf16.msra.mxu1 %v3847_v55  ;;  %3444 = vmatpush3.bf16.msra.mxu0 %v3848_v56 }
 0xb09   : > { %3423 = vmatprep.subr.bf16.mxu1 %v3849_v57  ;;  %3445 = vmatprep.subr.bf16.mxu0 %v3850_v58 }
 0xb0c   : > { %3424 = vmatpush3.bf16.msra.mxu1 %v3851_v59  ;;  %3446 = vmatpush3.bf16.msra.mxu0 %v3852_v60 }
 0xb0d   : > { %3425 = vmatprep.subr.bf16.mxu1 %v3853_v62  ;;  %3447 = vmatprep.subr.bf16.mxu0 %v3854_v63 }
 0xb10   : > { %3426 = vmatpush3.bf16.msra.mxu1 %v3855_v0  ;;  %3448 = vmatpush3.bf16.msra.mxu0 %v3856_v1 }
 0xb11   : > { %3427 = vmatprep.subr.bf16.mxu1 %v3857_v3  ;;  %3449 = vmatprep.subr.bf16.mxu0 %v3858_v4 }
 0xb14   : > { %3428 = vmatpush3.bf16.msra.mxu1 %v3859_v5  ;;  %3450 = vmatpush3.bf16.msra.mxu0 %v3860_v7 }
 0xbca   : > { %v2252_v14 = vpop.f32.mrb[44].mxu1  ;;  %v2295_v15 = vpop.f32.mrb[32].mxu0 }
 0xbcb   : > { %v5020_v23 = vadd.f32 %v2252_v14, %v2041_v9  ;;  %v5022_v16 = vadd.f32 %v2295_v15, %v2049_v6  ;;  %v2254_v17 = vpop.f32.mrb[45].mxu1  ;;  %v2297_v13 = vpop.f32.mrb[33].mxu0 }
 0xbcc   : > { %v5024_v19 = vadd.f32 %v2254_v17, %v2045_v11  ;;  %v5026_v20 = vadd.f32 %v2297_v13, %v2053_v12  ;;  %v2256_v21 = vpop.f32.mrb[46].mxu1  ;;  %v2299_v22 = vpop.f32.mrb[34].mxu0 }
 0xbcd   : > { %v5029_v61 = vmul.f32 0.70710677, %v5020_v23  ;;  %v5032_v24 = vmul.f32 0.70710677, %v5022_v16  ;;  %v2258_v38 = vpop.f32.mrb[47].mxu1  ;;  %v2301_v39 = vpop.f32.mrb[35].mxu0  ;;  %v5044_v40 = vadd.f32 %v2256_v21, %v2041_v9  ;;  %v5046_v18 = vadd.f32 %v2299_v22, %v2049_v6 }
 0xbce   : > { %v5035_v25 = vmul.f32 0.70710677, %v5024_v19  ;;  %v5038_v26 = vmul.f32 0.70710677, %v5026_v20  ;;  %v5051_v43 = vadd.f32 %v2258_v38, %v2045_v11  ;;  %v5057_v50 = vadd.f32 %v2301_v39, %v2053_v12 }
 0xbcf   : > { %v2320_v2 = vand.u32 2147483647, %v5029_v61  ;;  %v2322_v27 = vand.u32 2147483647, %v5032_v24  ;;  %v5049_v42 = vmul.f32 0.70710677, %v5044_v40 }
 0xbd0   : > { %v2321_v28 = vand.u32 2147483647, %v5035_v25  ;;  %v2323_v29 = vand.u32 2147483647, %v5038_v26  ;;  %v5054_v48 = vmul.f32 0.70710677, %v5046_v18 }
 0xbd1   : > { %v2328_v31 = vmul.f32 0.3275911, %v2320_v2  ;;  %v2330_v33 = vmul.f32 0.3275911, %v2322_v27  ;;  %v2432_v44 = vsub.f32 0.0, %v2320_v2  ;;  %v2434_v10 = vsub.f32 0.0, %v2322_v27 }
 0xbd2   : > { %v2329_v32 = vmul.f32 0.3275911, %v2321_v28  ;;  %v2331_v37 = vmul.f32 0.3275911, %v2323_v29  ;;  %v2324_v49 = vand.u32 2147483647, %v5049_v42 }
 0xbd3   : > { %v2336_v35 = vadd.f32 1.0, %v2328_v31  ;;  %v2338_v36 = vadd.f32 1.0, %v2330_v33  ;;  %v2433_v52 = vsub.f32 0.0, %v2321_v28  ;;  %v2326_v53 = vand.u32 2147483647, %v5054_v48 }
 0xbd4   : > { %v2337_v47 = vadd.f32 1.0, %v2329_v32  ;;  %v2339_v41 = vadd.f32 1.0, %v2331_v37  ;;  %v5061_v54 = vmul.f32 0.70710677, %v5051_v43  ;;  %v2435_v55 = vsub.f32 0.0, %v2323_v29 }
 0xbd5   : > { %3901 = vrcp.f32 %v2336_v35  ;;  %v2332_v56 = vmul.f32 0.3275911, %v2324_v49  ;;  %v2440_v57 = vmul.f32 %v2432_v44, %v2320_v2  ;;  %v2334_v58 = vmul.f32 0.3275911, %v2326_v53 }
 0xbd6   : > { %3903 = vrcp.f32 %v2338_v36  ;;  %v2325_v59 = vand.u32 2147483647, %v5061_v54  ;;  %v5065_v62 = vmul.f32 0.70710677, %v5057_v50  ;;  %v2442_v63 = vmul.f32 %v2434_v10, %v2322_v27 }
 0xbd7   : > { %3905 = vrcp.f32 %v2337_v47  ;;  %v2340_v60 = vadd.f32 1.0, %v2332_v56  ;;  %v2441_v0 = vmul.f32 %v2433_v52, %v2321_v28  ;;  %v2342_v1 = vadd.f32 1.0, %v2334_v58 }
 0xbd8   : > { %3907 = vrcp.f32 %v2339_v41  ;;  %v2333_v3 = vmul.f32 0.3275911, %v2325_v59  ;;  %v2443_v5 = vmul.f32 %v2435_v55, %v2323_v29  ;;  %v2436_v7 = vsub.f32 0.0, %v2324_v49 }
 0xbd9   : > { %3909 = vrcp.f32 %v2340_v60  ;;  %v5070_v8 = vand.u32 2147483647, %v5065_v62  ;;  %v2448_v11 = vmul.f32 1.442695, %v2440_v57  ;;  %v2438_v15 = vsub.f32 0.0, %v2326_v53 }
 0xbda   : > { %3911 = vrcp.f32 %v2342_v1  ;;  %v2341_v12 = vadd.f32 1.0, %v2333_v3  ;;  %v2452_v21 = vmul.f32 1.442695, %v2442_v63  ;;  %v2444_v27 = vmul.f32 %v2436_v7, %v2324_v49 }
 0xbdb   : > { %v2335_v17 = vmul.f32 0.3275911, %v5070_v8  ;;  %v2450_v33 = vmul.f32 1.442695, %v2441_v0  ;;  %v2454_v32 = vmul.f32 1.442695, %v2443_v5  ;;  %v2446_v37 = vmul.f32 %v2438_v15, %v2326_v53 }
 0xbdc   : > { %3913 = vrcp.f32 %v2341_v12  ;;  %v2437_v38 = vsub.f32 0.0, %v2325_v59  ;;  %v2456_v49 = vmul.f32 1.442695, %v2444_v27  ;;  %vm2480_vm7 = vcmp.ge.f32.partialorder %v5029_v61, 0.0 }
 0xbdd   : > { %v2343_v28 = vadd.f32 1.0, %v2335_v17  ;;  %3915 = vpow2.f32 %v2448_v11  ;;  %v2460_v53 = vmul.f32 1.442695, %v2446_v37  ;;  %vm2482_vm8 = vcmp.ge.f32.partialorder %v5032_v24, 0.0 }
 0xbde   : > { %v2445_v58 = vmul.f32 %v2437_v38, %v2325_v59  ;;  %vm2481_vm9 = vcmp.ge.f32.partialorder %v5035_v25, 0.0  ;;  %vm2484_vm10 = vcmp.ge.f32.partialorder %v5049_v42, 0.0  ;;  %vm2486_vm11 = vcmp.ge.f32.partialorder %v5054_v48, 0.0 }
 0xbdf   : > { %v5067_v4 = vpop.eup %3901  ;;  %3917 = vrcp.f32 %v2343_v28  ;;  %vm2485_vm12 = vcmp.ge.f32.partialorder %v5061_v54, 0.0  ;;  %vm2483_vm13 = vcmp.ge.f32.partialorder %v5038_v26, 0.0  ;;  %vm2487_vm14 = vcmp.ge.f32.partialorder %v5065_v62, 0.0 }
 0xbe0   : > { %v5072_v9 = vpop.eup %3903  ;;  %v2360_v6 = vmul.f32 1.0614054, %v5067_v4  ;;  %3919 = vpow2.f32 %v2452_v21  ;;  %v2458_v21 = vmul.f32 1.442695, %v2445_v58  ;;  %v2311_v26 = vmul.f32 0.5, %v5057_v50 }
 0xbe1   : > { %v2362_v14 = vmul.f32 1.0614054, %v5072_v9  ;;  %v5077_v22 = vpop.eup %3905  ;;  %3921 = vpow2.f32 %v2450_v33 }
 0xbe2   : > { %v2368_v13 = vadd.f32 -1.4531521, %v2360_v6  ;;  %v2361_v31 = vmul.f32 1.0614054, %v5077_v22  ;;  %v5081_v35 = vpop.eup %3907  ;;  %3923 = vpow2.f32 %v2454_v32  ;;  %v2439_v6 = vsub.f32 0.0, %v5070_v8 }
 0xbe3   : > { %v2370_v2 = vadd.f32 -1.4531521, %v2362_v14  ;;  %v2363_v41 = vmul.f32 1.0614054, %v5081_v35  ;;  %v5087_v56 = vpop.eup %3909  ;;  %3925 = vpow2.f32 %v2456_v49 }
 0xbe4   : > { %v2376_v29 = vmul.f32 %v5067_v4, %v2368_v13  ;;  %v2369_v47 = vadd.f32 -1.4531521, %v2361_v31  ;;  %v5090_v60 = vpop.eup %3911  ;;  %v2364_v3 = vmul.f32 1.0614054, %v5087_v56  ;;  %3927 = vpow2.f32 %v2460_v53 }
 0xbe5   : > { %v2378_v36 = vmul.f32 %v5072_v9, %v2370_v2  ;;  %v2371_v55 = vadd.f32 -1.4531521, %v2363_v41  ;;  %v2366_v7 = vmul.f32 1.0614054, %v5090_v60  ;;  %v2447_v37 = vmul.f32 %v2439_v6, %v5070_v8 }
 0xbe6   : > { %v2384_v39 = vadd.f32 1.4214138, %v2376_v29  ;;  %v2377_v52 = vmul.f32 %v5077_v22, %v2369_v47  ;;  %v2372_v59 = vadd.f32 -1.4531521, %v2364_v3  ;;  %v5098_v15 = vpop.eup %3913  ;;  %3929 = vpow2.f32 %v2458_v21 }
 0xbe7   : > { %v2386_v44 = vadd.f32 1.4214138, %v2378_v36  ;;  %v2379_v1 = vmul.f32 %v5081_v35, %v2371_v55  ;;  %v2374_v13 = vadd.f32 -1.4531521, %v2366_v7  ;;  %v3916_v31 = vpop.eup %3915  ;;  %v2365_v36 = vmul.f32 1.0614054, %v5098_v15 }
 0xbe8   : > { %v2392_v10 = vmul.f32 %v5067_v4, %v2384_v39  ;;  %v2385_v0 = vadd.f32 1.4214138, %v2377_v52  ;;  %v2380_v29 = vmul.f32 %v5087_v56, %v2372_v59 }
 0xbe9   : > { %v2394_v57 = vmul.f32 %v5072_v9, %v2386_v44  ;;  %v2387_v14 = vadd.f32 1.4214138, %v2379_v1  ;;  %v2382_v32 = vmul.f32 %v5090_v60, %v2374_v13  ;;  %v5106_v38 = vpop.eup %3917  ;;  %v2373_v55 = vadd.f32 -1.4531521, %v2365_v36 }
 0xbea   : > { %v2400_v63 = vadd.f32 -0.28449672, %v2392_v10  ;;  %v2393_v12 = vmul.f32 %v5077_v22, %v2385_v0  ;;  %v2388_v44 = vadd.f32 1.4214138, %v2380_v29  ;;  %v3920_v49 = vpop.eup %3919 }
 0xbeb   : > { %v2402_v5 = vadd.f32 -0.28449672, %v2394_v57  ;;  %v2395_v28 = vmul.f32 %v5081_v35, %v2387_v14  ;;  %v2390_v52 = vadd.f32 1.4214138, %v2382_v32  ;;  %v2367_v57 = vmul.f32 1.0614054, %v5106_v38  ;;  %v3922_v53 = vpop.eup %3921 }
 0xbec   : > { %v2408_v11 = vmul.f32 %v5067_v4, %v2400_v63  ;;  %v2401_v27 = vadd.f32 -0.28449672, %v2393_v12  ;;  %v2396_v0 = vmul.f32 %v5087_v56, %v2388_v44  ;;  %v3924_v1 = vpop.eup %3923 }
 0xbed   : > { %v2410_v17 = vmul.f32 %v5072_v9, %v2402_v5  ;;  %v2403_v41 = vadd.f32 -0.28449672, %v2395_v28  ;;  %v2398_v3 = vmul.f32 %v5090_v60, %v2390_v52  ;;  %v2381_v5 = vmul.f32 %v5098_v15, %v2373_v55  ;;  %v3926_v12 = vpop.eup %3925 }
 0xbee   : > { %v2416_v2 = vadd.f32 0.2548296, %v2408_v11  ;;  %v2409_v47 = vmul.f32 %v5077_v22, %v2401_v27  ;;  %v2375_v7 = vadd.f32 -1.4531521, %v2367_v57  ;;  %v2404_v11 = vadd.f32 -0.28449672, %v2396_v0  ;;  %v3928_v29 = vpop.eup %3927 }
 0xbef   : > { %v2418_v33 = vadd.f32 0.2548296, %v2410_v17  ;;  %v2411_v8 = vmul.f32 %v5081_v35, %v2403_v41  ;;  %v2406_v14 = vadd.f32 -0.28449672, %v2398_v3  ;;  %v2389_v59 = vadd.f32 1.4214138, %v2381_v5 }
 0xbf0   : > { %v2424_v39 = vmul.f32 %v5067_v4, %v2416_v2  ;;  %v2417_v63 = vadd.f32 0.2548296, %v2409_v47  ;;  %v2383_v17 = vmul.f32 %v5106_v38, %v2375_v7  ;;  %v2412_v27 = vmul.f32 %v5087_v56, %v2404_v11 }
 0xbf1   : > { %v2426_v10 = vmul.f32 %v5072_v9, %v2418_v33  ;;  %v2419_v6 = vadd.f32 0.2548296, %v2411_v8  ;;  %v2462_v28 = vmul.f32 1.442695, %v2447_v37  ;;  %v2414_v33 = vmul.f32 %v5090_v60, %v2406_v14 }
 0xbf2   : > { %v2464_v58 = vmul.f32 %v3916_v31, %v2424_v39  ;;  %v2425_v9 = vmul.f32 %v5077_v22, %v2417_v63  ;;  %v2397_v32 = vmul.f32 %v5098_v15, %v2389_v59  ;;  %v2391_v22 = vadd.f32 1.4214138, %v2383_v17 }
 0xbf3   : > { %v2466_v4 = vmul.f32 %v3920_v49, %v2426_v10  ;;  %v2427_v36 = vmul.f32 %v5081_v35, %v2419_v6  ;;  %v2420_v39 = vadd.f32 0.2548296, %v2412_v27  ;;  %v2304_v47 = vmul.f32 0.5, %v5020_v23 }
 0xbf4   : > { %v2472_v13 = vsub.f32 1.0, %v2464_v58  ;;  %v2465_v31 = vmul.f32 %v3922_v53, %v2425_v9  ;;  %v2422_v21 = vadd.f32 0.2548296, %v2414_v33  ;;  %v2405_v41 = vadd.f32 -0.28449672, %v2397_v32 }
 0xbf5   : > { %v2474_v2 = vsub.f32 1.0, %v2466_v4  ;;  %v2428_v10 = vmul.f32 %v5087_v56, %v2420_v39  ;;  %3931 = vpow2.f32 %v2462_v28  ;;  %v2399_v57 = vmul.f32 %v5106_v38, %v2391_v22  ;;  %v3930_v4 = vpop.eup %3929 }
 0xbf6   : > { %v2488_v44 = vsub.f32 0.0, %v2472_v13  ;;  %v2473_v37 = vsub.f32 1.0, %v2465_v31  ;;  %v2430_v52 = vmul.f32 %v5090_v60, %v2422_v21  ;;  %v2413_v55 = vmul.f32 %v5098_v15, %v2405_v41 }
 0xbf7   : > { %v2490_v49 = vsub.f32 0.0, %v2474_v2  ;;  %v2306_v53 = vmul.f32 0.5, %v5022_v16  ;;  %v2305_v35 = vmul.f32 0.5, %v5024_v19  ;;  %v2467_v58 = vmul.f32 %v3924_v1, %v2427_v36 }
 0xbf8   : > { %v2468_v23 = vmul.f32 %v3926_v12, %v2428_v10  ;;  %v2470_v63 = vmul.f32 %v3928_v29, %v2430_v52  ;;  %v2421_v8 = vadd.f32 0.2548296, %v2413_v55  ;;  %v2407_v0 = vadd.f32 -0.28449672, %v2399_v57 }
 0xbf9   : > { %v2496_v56 = vsel %vm2480_vm7, %v2472_v13, %v2488_v44  ;;  %v2498_v3 = vsel %vm2482_vm8, %v2474_v2, %v2490_v49  ;;  %v2489_v5 = vsub.f32 0.0, %v2473_v37  ;;  %v2475_v19 = vsub.f32 1.0, %v2467_v58 }
 0xbfa   : > { %v2476_v60 = vsub.f32 1.0, %v2468_v23  ;;  %v2478_v7 = vsub.f32 1.0, %v2470_v63  ;;  %v2429_v16 = vmul.f32 %v5098_v15, %v2421_v8  ;;  %v2308_v1 = vmul.f32 0.5, %v5044_v40  ;;  %v3935_v8 = vld [vmem:[%s4654_s17] sm:$0x3f]  ;;  %s5280_s17 = sld [smem:[#allocation27_spill]] (!%p3345_p13) }
 0xbfb   : > { %v2415_v61 = vmul.f32 %v5106_v38, %v2407_v0  ;;  %v2504_v6 = vadd.f32 1.0, %v2496_v56  ;;  %v2506_v12 = vadd.f32 1.0, %v2498_v3  ;;  %v2497_v17 = vsel %vm2481_vm9, %v2473_v37, %v2489_v5 }
 0xbfc   : > { %v2492_v9 = vsub.f32 0.0, %v2476_v60  ;;  %v2494_v11 = vsub.f32 0.0, %v2478_v7  ;;  %v2469_v24 = vmul.f32 %v3930_v4, %v2429_v16  ;;  %v2491_v27 = vsub.f32 0.0, %v2475_v19 }
 0xbfd   : > { %v2423_v59 = vadd.f32 0.2548296, %v2415_v61  ;;  %v2310_v28 = vmul.f32 0.5, %v5046_v18  ;;  %v2512_v31 = vmul.f32 %v2504_v6, %v2304_v47  ;;  %v2514_v48 = vmul.f32 %v2506_v12, %v2306_v53 }
 0xbfe   : > { %v2500_v14 = vsel %vm2484_vm10, %v2476_v60, %v2492_v9  ;;  %v2502_v13 = vsel %vm2486_vm11, %v2478_v7, %v2494_v11  ;;  %v2477_v2 = vsub.f32 1.0, %v2469_v24  ;;  %v2505_v22 = vadd.f32 1.0, %v2497_v17 }
 0xbff   : > { %v2508_v15 = vadd.f32 1.0, %v2500_v14  ;;  %v3932_v40 = vpop.eup %3931  ;;  %v2510_v29 = vadd.f32 1.0, %v2502_v13  ;;  %v2431_v42 = vmul.f32 %v5106_v38, %v2423_v59  ;;  %v2309_v21 = vmul.f32 0.5, %v5051_v43 }
 0xc00   : > { %v2493_v32 = vsub.f32 0.0, %v2477_v2  ;;  %v2499_v44 = vsel %vm2483_vm13, %v2475_v19, %v2491_v27  ;;  %v2513_v38 = vmul.f32 %v2505_v22, %v2305_v35  ;;  %v2307_v57 = vmul.f32 0.5, %v5026_v20 }
 0xc01   : > { %v2516_v33 = vmul.f32 %v2508_v15, %v2308_v1  ;;  %v2518_v36 = vmul.f32 %v2510_v29, %v2310_v28  ;;  %v2471_v25 = vmul.f32 %v3932_v40, %v2431_v42  ;;  %v2507_v52 = vadd.f32 1.0, %v2499_v44  ;;  %v3938_v28 = vld [vmem:[%s5231_s9 + $0x10] sm:$0xff] (!%p3345_p13)   ;;  %v3939_v29 = vld [vmem:[%s5231_s9 + $0x18] sm:$0xff] (!%p3345_p13)   ;;  %v3940_v42 = vld [vmem:[%s5231_s9 + $0x20] sm:$0xff] (!%p3345_p13)  }
 0xc02   : > { %v2501_v41 = vsel %vm2485_vm12, %v2477_v2, %v2493_v32  ;;  %v2590_v35 = vsub.s32 5, %v4705_v45  ;;  %v4253_v17 = vmov (!%p3345_p13), 0.0   ;;  %v3943_v32 = vld [vmem:[%s5231_s9 + $0x38] sm:$0xff] (!%p3345_p13)  }
 0xc03   : > { %v2520_v39 = vpack.c.bf16 %v2516_v33, %v2512_v31  ;;  %v2522_v18 = vpack.c.bf16 %v2518_v36, %v2514_v48  ;;  %v2509_v49 = vadd.f32 1.0, %v2501_v41  ;;  %v2479_v10 = vsub.f32 1.0, %v2471_v25  ;;  %3602 = vmatprep.subr.bf16.mxu0 (!%p3345_p13), %v4253_v17  ;;  %v3941_v31 = vld [vmem:[%s5231_s9 + $0x28] sm:$0xff] (!%p3345_p13)   ;;  %v3942_v33 = vld [vmem:[%s5231_s9 + $0x30] sm:$0xff] (!%p3345_p13)   ;;  %v2882_v25 = vld [vmem:[%s5280_s17] sm:$0x3] (!%p3345_p13) }
 0xc04   : > { %v2515_v43 = vmul.f32 %v2507_v52, %v2307_v57  ;;  %v2591_v0 = vrot.slane %v3935_v8, %v2590_v35  ;;  %v2905_v44 = vrot.slane (!%p3345_p13), %v2882_v25, %v4717_v51 }
 0xc05   : > { %v2517_v47 = vmul.f32 %v2509_v49, %v2309_v21  ;;  %v2495_v37 = vsub.f32 0.0, %v2479_v10 }
 0xc07   : > { %v2503_v54 = vsel %vm2487_vm14, %v2479_v10, %v2495_v37  ;;  %v2521_v55 = vpack.c.bf16 %v2517_v47, %v2513_v38  ;;  %v3346_v38 = vld [vmem:[%s5281_s21] ss:$0 sm:$0xff] (!%p3345_p13) }
 0xc08   : > { %v2511_v53 = vadd.f32 1.0, %v2503_v54 }
 0xc09   : > { %2816 = vmatprep.mubr.bf16.mxu1 %v2521_v55 }
 0xc0a   : > { %v2519_v58 = vmul.f32 %v2511_v53, %v2311_v26  ;;  %2817 = vmatmul.mubr.bf16.vlgmr.msra.gmra.mrb[48].mxu1 %v2520_v39  ;;  %v2900_v39 = vrot.slane (!%p3345_p13), %v2882_v25, %v4708_v46 }
 0xc0c   : > { %v2523_v23 = vpack.c.bf16 %v2519_v58, %v2515_v43 }
 0xc0e   : > { %2857 = vmatprep.mubr.bf16.mxu0 %v2523_v23 }
 0xc0f   : > { %2858 = vmatmul.mubr.bf16.vlgmr.msra.gmra.mrb[36].mxu0 %v2522_v18 }
 0xc10   : > { %3618 = vmatprep.mubr.msk.bf16.mxu0 (!%p3345_p13), %vm4254_vm1, %v4253_v17 }
 0xcdd   : > { %v3429_v63 = vpop.f32.mrb[48].mxu1 }
 0xcde   : > { %v3430_v62 = vpop.f32.mrb[49].mxu1 }
 0xcdf   : > { %v3431_v56 = vadd.f32 %v3430_v62, %v3429_v63  ;;  %v3432_v60 = vpop.f32.mrb[50].mxu1 }
 0xce0   : > { %v3433_v4 = vpop.f32.mrb[51].mxu1 }
 0xce1   : > { %v3434_v20 = vadd.f32 %v3433_v4, %v3432_v60  ;;  %v2819_v50 = vadd.f32 %v3431_v56, %v2591_v0 }
 0xce2   : > { %v3451_v3 = vpop.f32.mrb[36].mxu0 }
 0xce3   : > { %v3452_v5 = vpop.f32.mrb[37].mxu0  ;;  %v2822_v19 = vadd.f32 %v3434_v20, %v2591_v0 }
 0xce4   : > { %v3453_v7 = vadd.f32 %v3452_v5, %v3451_v3  ;;  %v3454_v16 = vpop.f32.mrb[38].mxu0 }
 0xce5   : > { %v3455_v1 = vpop.f32.mrb[39].mxu0 }
 0xce6   : > { %v2860_v9 = vadd.f32 %v3453_v7, %v2819_v50  ;;  %v3456_v61 = vadd.f32 %v3455_v1, %v3454_v16  ;;  %2873 = sbr.rel (%p3345_p13) target bundleno = 3841 (0xf01), region = 100 }
 0xce8   : > { %v2866_v6 = vadd.f32 %v2860_v9, %v4926_v30  ;;  %v2863_v45 = vadd.f32 %v3456_v61, %v2822_v19  ;;  %v3936_v30 = vld [vmem:[%s5231_s9] sm:$0xff] (!%p3345_p13)  }
 0xce9   : > { %3603 = vmatpush3.bf16.msra.mxu0 (!%p3345_p13), %v3936_v30 }
 0xcea   : > { %2868 = vst [vmem:[#allocation2] sm:$0xff] %v2866_v6  ;;  %v2867_v11 = vadd.f32 %v2863_v45, %v4928_v34  ;;  %v2875_v24 = vrot.slane (!%p3345_p13), %v2866_v6, 7  ;;  %v3937_v34 = vld [vmem:[%s5231_s9 + $0x8] sm:$0xff] (!%p3345_p13)   ;;  %3604 = vmatprep.subr.bf16.mxu0 (!%p3345_p13), %v4253_v17 }
 0xcec   : > { %2869 = vst [vmem:[#allocation2 + $0x8] sm:$0xff] %v2867_v11  ;;  %v2878_v12 = vrot.slane (!%p3345_p13), %v2867_v11, 6 }
 0xced   : > { %3605 = vmatpush3.bf16.msra.mxu0 %v3937_v34 }
 0xcee   : > { %v2881_v14 = vsel %vm2880_vm15, %v2875_v24, %v2878_v12  ;;  %3606 = vmatprep.subr.bf16.mxu0 %v4253_v17 }
 0xcef   : > { %v2884_v59 = vsel %vm2883_vm0, %v2881_v14, 0.0 }
 0xcf0   : > { %2885 = vadd.xlane.f32.xlu0 %v2884_v59 }
 0xcf1   : > { %3607 = vmatpush3.bf16.msra.mxu0 %v3938_v28 }
 0xcf2   : > { %3608 = vmatprep.subr.bf16.mxu0 %v4253_v17 }
 0xcf5   : > { %3609 = vmatpush3.bf16.msra.mxu0 %v3939_v29 }
 0xcf6   : > { %3610 = vmatprep.subr.bf16.mxu0 %v4253_v17 }
 0xcf9   : > { %3611 = vmatpush3.bf16.msra.mxu0 %v3940_v42 }
 0xcfa   : > { %3612 = vmatprep.subr.bf16.mxu0 %v4253_v17 }
 0xcfd   : > { %3613 = vmatpush3.bf16.msra.mxu0 %v3941_v31 }
 0xcfe   : > { %3614 = vmatprep.subr.bf16.mxu0 %v4253_v17 }
 0xd01   : > { %3615 = vmatpush3.bf16.msra.mxu0 %v3942_v33 }
 0xd02   : > { %3616 = vmatprep.subr.bf16.mxu0 %v4253_v17 }
 0xd05   : > { %3617 = vmatpush3.bf16.msra.mxu0 %v3943_v32 }
 0xd7d   : > { %v2886_v15 = vpop.xlane.xlu0 %2885 }
 0xd7e   : > { %v2887_v13 = vmul.f32 0.0078125, %v2886_v15 }
 0xd80   : > { %v2888_v2 = vsub.f32 %v2881_v14, %v2887_v13 }
 0xd82   : > { %v2889_v40 = vmul.f32 %v2888_v2, %v2888_v2 }
 0xd84   : > { %v2890_v27 = vsel %vm2883_vm0, %v2889_v40, 0.0 }
 0xd85   : > { %2891 = vadd.xlane.f32.xlu0 %v2890_v27 }
 0xe12   : > { %v2892_v48 = vpop.xlane.xlu0 %2891 }
 0xe13   : > { %v2893_v22 = vmul.f32 0.0078125, %v2892_v48 }
 0xe15   : > { %v2894_v36 = vadd.f32 1e-05, %v2893_v22 }
 0xe17   : > { %3944 = vrsqrt.f32 %v2894_v36 }
 0xe21   : > { %v3945_v21 = vpop.eup %3944 }
 0xe22   : > { %v2896_v41 = vmul.f32 %v3945_v21, %v2888_v2 }
 0xe24   : > { %v2901_v18 = vmul.f32 %v2900_v39, %v2896_v41 }
 0xe26   : > { %v2906_v49 = vadd.f32 %v2905_v44, %v2901_v18 }
 0xe28   : > { %v2907_v10 = vpack.c.bf16 %v2906_v49, %v2906_v49 }
 0xe2a   : > { %3619 = vmatmul.mubr.bf16.vlgmr.msra.gmra.mrb[0].mxu0 %v2907_v10 }
 0xefd   : > { %v3013_v47 = vpop.f32.mrb[0].mxu0 }
 0xefe   : > { %v3014_v37 = vadd.f32 %v3346_v38, %v3013_v47  ;;  %v3620_v52 = vpop.f32.mrb[1].mxu0 }
 0xeff   : > { %v3016_v54 = vpop.f32.mrb[2].mxu0 }
 0xf00   : > { %3019 = vst [vmem:[#allocation15] sm:$0x3] %v3014_v37  ;;  %v3621_v55 = vpop.f32.mrb[3].mxu0 }
 0xf01 PF: > { %p3674_p0 = scmp.eq.s32.totalorder %s4449_s3, 1  ;;  %s4255_s23 = smov [#allocation15]  }
 0xf02   : > { %s3027_s27 = sshll.u32 %s4255_s23, 4  ;;  %s3028_s27 = int_to_ptr.vmem [resolvable:$true] %s3027_s27 }
 0xf03   : > { %s4154_s19 = scalar_lea.vmem %s3028_s27, 32  ;;  %p4161_p2 = scmp.lt.s32.totalorder %s3028_s27, %s3028_s27 }
 0xf04   : > { %p4155_p8 = scmp.ne.s32.totalorder %s3028_s27, %s4154_s19  ;;  %p4162_p1 = scmp.lt.s32.totalorder %s4154_s19, %s4154_s19 }
 0xf06   : > { %p4156_p4 = pnand %p4155_p8, %p3674_p0  ;;  %p4163_p9 = por %p4162_p1, %p4161_p2 }
 0xf08   : > { %p4157_p6 = pneg %p4156_p4 }
 0xf0a   : > { %p4164_p10 = pnand %p4163_p9, %p4157_p6 }
 0xf0c   : > { %4167 = shalt.err (!%p4164_p10)
}
 0xf0d   : > { %s5282_s25 = sld [smem:[#allocation29_spill]] }
 0xf13   : > { %s4168_s15 = scalar_lea.hbm %s5282_s25, 32 }
 0xf14   : > { %p4169_p3 = scmp.ne.s32.totalorder %s5282_s25, %s4168_s15  ;;  %p4174_p12 = scmp.lt.u32.totalorder %s4168_s15, %s5282_s25 }
 0xf16   : > { %p4170_p11 = pnand %p4169_p3, %p3674_p0 }
 0xf18   : > { %p4171_p5 = pneg %p4170_p11 }
 0xf1a   : > { %p4176_p7 = pnand %p4174_p12, %p4171_p5 }
 0xf1c   : > { %4179 = shalt.err (!%p4176_p7)
}
 0xf1d   : > { %3645 = dma.vmem_to_hbm [thread:$0]  (%p3674_p0), %s3028_s27, 32, %s5282_s25, [#allocation5]  }
 0xf1e   : > { %4213 = dma.done.wait (%p3674_p0), [#allocation5], 32  }
 0xf1f   : > { %4215 = vsyncadd (%p3674_p0), [#allocation5], 4294967264 }
 0xf20 PF: > { %s5283_s20 = sld [smem:[#allocation22_spill]]  ;;  %s5284_s26 = sld [smem:[#allocation21_spill]] }
 0xf21   : > { %s5285_s19 = sld [smem:[#allocation23_spill]]  ;;  %s5286_s17 = smov %s4222_s18 }
 0xf26   : > { %p29_p13 = scmp.ge.s32.totalorder %s5283_s20, 4   ;;  %s5287_s18 = smov %s5284_s26 }
 0xf28   :  { %31 = sbr.rel (!%p29_p13) target bundleno = 16 (0x10), region = 176 }
 0xf2f   :  { %3040 = vsyncpa [#allocation4], 1 }
 0xf30   :  { %3042 = vsyncpa [#allocation4 + $0x1], 1 }
 0xf31   :  { %3043 = vsyncpa [#allocation7], 1 }
 0xf32   :  { %3045 = vsyncpa [#allocation7 + $0x1], 1 }
 0xf33   :  { %3046 = vsyncpa [#allocation10], 1 }
 0xf34   :  { %3048 = vsyncpa [#allocation10 + $0x1], 1 }
 0xf35   :  { %3049 = vsyncpa [#allocation13], 1 }
 0xf36   :  { %3051 = vsyncpa [#allocation13 + $0x1], 1 }
 0xf37   :  { %3052 = vsyncpa [#allocation5], 1 }
 0xf38   :  { %3054 = vsyncpa [#allocation5 + $0x1], 1 }

</bundles_post_ra>
